<compile_context>
chip_gen: v7x
topology: tpu7x:2x2x1
jax: 0.10.0
libtpu: 0.0.40
codegen_flags: <defaults>
</compile_context>

<pallas_src>
import numpy as np
import jax
import jax.numpy as jnp
from jax import lax
from jax.experimental import pallas as pl
from jax.experimental.pallas import tpu as pltpu

L0 = 23          # input length
L1 = 11          # after pool1
L2 = 5           # after pool2
L3 = 2           # after pool3
C1, C2, C3 = 16, 32, 16
H = 128          # fc1 hidden
OUT = 16         # fc2 out
OUT_PAD = 128    # lane-dense output width (wrapper slices back to 16)

N1 = L1 * C1     # 176
N2 = L2 * C2     # 160
N3 = L3 * C3     # 32


def _round_up(n, m):
    return (n + m - 1) // m * m


def _num_tensorcores():
    """Best-effort: 2 TensorCores per chip on v7x, 1 on v5e/v6e."""
    try:
        kind = jax.devices()[0].device_kind.lower()
    except Exception:
        return 1
    return 2 if "v7" in kind else 1


def _build_stage_mat(w, b, l_in):
    """Fold conv1d(k=3, 'same' pad) + maxpool(k=2, s=2) into one (l_in*cin, 2*l_pool*cout)
    matrix [ME | MO] plus a (1, l_pool*cout) bias row (host-side numpy, exact f32):
        stage(a) = relu( max( (a @ W)[:, :N], (a @ W)[:, N:] ) + bias_row )
    Lane layouts: input lane = l*cin + cin_idx (l-major); output lane = l_pool*cout + cout_idx.
    NOTE: do not move/remove the ReLU relative to the pool without revisiting this fold.
    """
    w = np.asarray(w, np.float32)                  # PyTorch conv weight (cout, cin, K=3)
    b = np.asarray(b, np.float32)
    cout, cin, K = w.shape
    l_pool = l_in // 2
    mats = []
    for parity in (0, 1):                          # even / odd element of each pool window
        m = np.zeros((l_in, cin, l_pool, cout), np.float32)
        for lp in range(l_pool):
            lo = 2 * lp + parity                   # conv-output position selected by the pool
            for k in range(K):
                li = lo + k - 1                    # input position of tap k ("same" padding)
                if 0 <= li < l_in:
                    m[li, :, lp, :] += w[:, :, k].T          # (cin, cout)
        mats.append(m.reshape(l_in * cin, l_pool * cout))
    wcat = np.concatenate(mats, axis=1)            # (l_in*cin, 2*N) = [ME | MO]
    brow = np.tile(b, l_pool).reshape(1, l_pool * cout)      # channel-only bias row
    return wcat, brow


def modified_cnn_kernel(x_ref, w1_ref, b1_ref, w2_ref, b2_ref, w3_ref, b3_ref,
                        wfc1_ref, bfc1_ref, wfc2_ref, bfc2_ref, out_ref):
    f32 = jnp.float32
    bf16 = jnp.bfloat16

    def stage(a, w_ref, b_ref, n):
        # one bf16 matmul for both pooling parities, f32 accumulation on the MXU
        r = jnp.dot(a.astype(bf16), w_ref[...], preferred_element_type=f32)   # (TB, 2n)
        m = jnp.maximum(r[:, :n], r[:, n:])
        # bias is channel-only -> identical for even/odd selection; relu(max) == max(relu)
        return jnp.maximum(m + b_ref[...], 0.0)

    x = x_ref[...]                                 # (TB, 23) f32
    a = stage(x, w1_ref, b1_ref, N1)               # (TB, 176)
    a = stage(a, w2_ref, b2_ref, N2)               # (TB, 160)
    a = stage(a, w3_ref, b3_ref, N3)               # (TB, 32)

    z = jnp.maximum(jnp.dot(a.astype(bf16), wfc1_ref[...], preferred_element_type=f32)
                    + bfc1_ref[...], 0.0)          # (TB, 128)
    out_ref[...] = (jnp.dot(z.astype(bf16), wfc2_ref[...], preferred_element_type=f32)
                    + bfc2_ref[...])               # (TB, 128) lane-dense; cols 16: are zero


def make_modified_cnn_forward(params, batch_tile=1024):
    """Fold weights once (host-side) and return a jitted forward: (B,1,23) f32 -> (B,16) f32."""
    (w1, b1, w2, b2, w3, b3, wfc1, bfc1, wfc2, bfc2) = [np.asarray(p, np.float32)
                                                        for p in params]

    m1, br1 = _build_stage_mat(w1, b1, L0)         # (23, 352),  (1, 176)
    m2, br2 = _build_stage_mat(w2, b2, L1)         # (176, 320), (1, 160)
    m3, br3 = _build_stage_mat(w3, b3, L2)         # (160, 64),  (1, 32)

    # fc1: PyTorch flatten of (C3=16, L3=2) is channel-major (flat = c*2 + l);
    # our activation lane index is l*16 + c  ->  reindex the fc1 weight accordingly.
    wfc1k = np.transpose(wfc1.reshape(H, C3, L3), (2, 1, 0)).reshape(L3 * C3, H)
    bfc1r = bfc1.reshape(1, H)

    # fc2: zero-pad to 128 output lanes so the final store is a full unmasked block store.
    wfc2k = np.zeros((H, OUT_PAD), np.float32); wfc2k[:, :OUT] = wfc2.T
    bfc2r = np.zeros((1, OUT_PAD), np.float32); bfc2r[0, :OUT] = bfc2

    # Matmul operands in bf16 (f32 accumulation in-kernel); biases stay f32.
    weights = (
        jnp.asarray(m1, jnp.bfloat16), jnp.asarray(br1),
        jnp.asarray(m2, jnp.bfloat16), jnp.asarray(br2),
        jnp.asarray(m3, jnp.bfloat16), jnp.asarray(br3),
        jnp.asarray(wfc1k, jnp.bfloat16), jnp.asarray(bfc1r),
        jnp.asarray(wfc2k, jnp.bfloat16), jnp.asarray(bfc2r),
    )

    ncores = _num_tensorcores()

    def forward(x):
        B = x.shape[0]
        x2 = x.reshape(B, L0).astype(jnp.float32)  # batch on sublanes, length on lanes

        # Tile count: minimize padding waste; on v7x keep the grid a multiple of 2 so both
        # TensorCores get work through dimension_semantics=("parallel",).
        ntiles = max(1, -(-B // batch_tile))
        if ncores > 1 and B >= 8 * ncores:
            ntiles = _round_up(max(ntiles, ncores), ncores)
        tb = _round_up(-(-B // ntiles), 8)
        b_pad = ntiles * tb
        if b_pad != B:
            x2 = jnp.pad(x2, ((0, b_pad - B), (0, 0)))

        # Constant index_maps -> weights stay resident in VMEM across grid steps.
        # (pl.Buffered(1) would also drop their double-buffer copy; skipped, negligible here.)
        in_specs = ([pl.BlockSpec((tb, L0), lambda i: (i, 0))]
                    + [pl.BlockSpec(w.shape, lambda i: (0, 0)) for w in weights])

        out = pl.pallas_call(
            modified_cnn_kernel,
            out_shape=jax.ShapeDtypeStruct((b_pad, OUT_PAD), jnp.float32),
            grid_spec=pltpu.PrefetchScalarGridSpec(
                num_scalar_prefetch=0,
                grid=(ntiles,),
                in_specs=in_specs,
                out_specs=pl.BlockSpec((tb, OUT_PAD), lambda i: (i, 0)),
            ),
            compiler_params=pltpu.CompilerParams(dimension_semantics=("parallel",)),
        )(x2, *weights)
        return out[:B, :OUT]

    return jax.jit(forward)


def ref_forward(x, params):
    """Pure-JAX reference identical to the PyTorch module (f32, HIGHEST precision)."""
    (w1, b1, w2, b2, w3, b3, wfc1, bfc1, wfc2, bfc2) = params
    hp = lax.Precision.HIGHEST

    def conv1d(h, w, b):
        y = lax.conv_general_dilated(h, w, window_strides=(1,), padding=((1, 1),),
                                     dimension_numbers=("NCH", "OIH", "NCH"), precision=hp)
        return y + b[None, :, None]

    def pool(h):
        return lax.reduce_window(h, -jnp.inf, lax.max,
                                 window_dimensions=(1, 1, 2),
                                 window_strides=(1, 1, 2), padding="VALID")

    h = pool(jax.nn.relu(conv1d(x, w1, b1)))
    h = pool(jax.nn.relu(conv1d(h, w2, b2)))
    h = pool(jax.nn.relu(conv1d(h, w3, b3)))
    h = h.reshape(h.shape[0], -1)
    h = jax.nn.relu(jnp.dot(h, wfc1.T, precision=hp) + bfc1)
    return jnp.dot(h, wfc2.T, precision=hp) + bfc2


if __name__ == "__main__":
    key = jax.random.PRNGKey(0)
    keys = jax.random.split(key, 11)
    B = 300          # deliberately not a tile multiple: exercises remainder/padding path
    x = jax.random.normal(keys[0], (B, 1, L0), dtype=jnp.float32)

    def u(k, shape, fan_in):
        bound = 1.0 / np.sqrt(fan_in)
        return jax.random.uniform(k, shape, jnp.float32, -bound, bound)

    params = (
        u(keys[1], (16, 1, 3), 1 * 3),   u(keys[2], (16,), 1 * 3),     # conv1
        u(keys[3], (32, 16, 3), 16 * 3), u(keys[4], (32,), 16 * 3),    # conv2
        u(keys[5], (16, 32, 3), 32 * 3), u(keys[6], (16,), 32 * 3),    # conv3
        u(keys[7], (128, 32), 32),       u(keys[8], (128,), 32),       # fc1
        u(keys[9], (16, 128), 128),      u(keys[10], (16,), 128),      # fc2
    )

    fwd = make_modified_cnn_forward(params, batch_tile=128)   # >= 2 grid steps at B=300
    out = jax.block_until_ready(fwd(x))

    ref = ref_forward(x, params)
    # bf16 MXU operands with f32 accumulation -> ~1% relative error vs the f32 reference.
    np.testing.assert_allclose(np.asarray(out), np.asarray(ref), rtol=5e-2, atol=2e-2)
    print("KERNEL_OK")
</pallas_src>

<mosaic_0001>
module attributes {stable_mosaic.version = 11 : i64} {
  func.func @modified_cnn_kernel(%arg0: i32, %arg1: memref<104x23xf32, #tpu.memory_space<vmem>>, %arg2: memref<23x352xbf16, #tpu.memory_space<vmem>>, %arg3: memref<1x176xf32, #tpu.memory_space<vmem>>, %arg4: memref<176x320xbf16, #tpu.memory_space<vmem>>, %arg5: memref<1x160xf32, #tpu.memory_space<vmem>>, %arg6: memref<160x64xbf16, #tpu.memory_space<vmem>>, %arg7: memref<1x32xf32, #tpu.memory_space<vmem>>, %arg8: memref<32x128xbf16, #tpu.memory_space<vmem>>, %arg9: memref<1x128xf32, #tpu.memory_space<vmem>>, %arg10: memref<128x128xbf16, #tpu.memory_space<vmem>>, %arg11: memref<1x128xf32, #tpu.memory_space<vmem>>, %arg12: memref<104x128xf32, #tpu.memory_space<vmem>>) attributes {dimension_semantics = [#tpu.dimension_semantics<parallel>], iteration_bounds = array<i64: 3>, scalar_prefetch = 0 : i64, scratch_operands = 0 : i64, tpu.core_type = #tpu.core_type<tc>, window_params = [{transform_indices = @transform_0, window_bounds = array<i64: 104, 23>}, {pipeline_mode = #tpu.pipeline_mode<synchronous>, transform_indices = @transform_1, window_bounds = array<i64: 23, 352>}, {pipeline_mode = #tpu.pipeline_mode<synchronous>, transform_indices = @transform_2, window_bounds = array<i64: 1, 176>}, {pipeline_mode = #tpu.pipeline_mode<synchronous>, transform_indices = @transform_3, window_bounds = array<i64: 176, 320>}, {pipeline_mode = #tpu.pipeline_mode<synchronous>, transform_indices = @transform_4, window_bounds = array<i64: 1, 160>}, {pipeline_mode = #tpu.pipeline_mode<synchronous>, transform_indices = @transform_5, window_bounds = array<i64: 160, 64>}, {pipeline_mode = #tpu.pipeline_mode<synchronous>, transform_indices = @transform_6, window_bounds = array<i64: 1, 32>}, {pipeline_mode = #tpu.pipeline_mode<synchronous>, transform_indices = @transform_7, window_bounds = array<i64: 32, 128>}, {pipeline_mode = #tpu.pipeline_mode<synchronous>, transform_indices = @transform_8, window_bounds = array<i64: 1, 128>}, {pipeline_mode = #tpu.pipeline_mode<synchronous>, transform_indices = @transform_9, window_bounds = array<i64: 128, 128>}, {pipeline_mode = #tpu.pipeline_mode<synchronous>, transform_indices = @transform_10, window_bounds = array<i64: 1, 128>}, {transform_indices = @transform_11, window_bounds = array<i64: 104, 128>}]} {
    %c0 = arith.constant 0 : index
    %c0_0 = arith.constant 0 : index
    %0 = vector.load %arg1[%c0, %c0_0] : memref<104x23xf32, #tpu.memory_space<vmem>>, vector<104x23xf32>
    %1 = arith.truncf %0 : vector<104x23xf32> to vector<104x23xbf16>
    %c0_1 = arith.constant 0 : index
    %c0_2 = arith.constant 0 : index
    %2 = vector.load %arg2[%c0_1, %c0_2] : memref<23x352xbf16, #tpu.memory_space<vmem>>, vector<23x352xbf16>
    %cst = arith.constant dense<0.000000e+00> : vector<104x352xf32>
    %3 = tpu.matmul %1, %2, %cst {dimension_numbers = #tpu.dot_dimension_numbers<[1], [0], [0], [1], [0, 0, 1, 1], [], []>} : vector<104x23xbf16>, vector<23x352xbf16>, vector<104x352xf32> -> vector<104x352xf32>
    %4 = vector.extract_strided_slice %3 {offsets = [0, 0], sizes = [104, 176], strides = [1, 1]} : vector<104x352xf32> to vector<104x176xf32>
    %5 = vector.extract_strided_slice %3 {offsets = [0, 176], sizes = [104, 176], strides = [1, 1]} : vector<104x352xf32> to vector<104x176xf32>
    %6 = arith.maximumf %4, %5 : vector<104x176xf32>
    %c0_3 = arith.constant 0 : index
    %c0_4 = arith.constant 0 : index
    %7 = vector.load %arg3[%c0_3, %c0_4] : memref<1x176xf32, #tpu.memory_space<vmem>>, vector<1x176xf32>
    %8 = vector.broadcast %7 : vector<1x176xf32> to vector<104x176xf32>
    %9 = arith.addf %6, %8 : vector<104x176xf32>
    %cst_5 = arith.constant 0.000000e+00 : f32
    %10 = vector.broadcast %cst_5 : f32 to vector<104x176xf32>
    %11 = arith.maximumf %9, %10 : vector<104x176xf32>
    %12 = arith.truncf %11 : vector<104x176xf32> to vector<104x176xbf16>
    %c0_6 = arith.constant 0 : index
    %c0_7 = arith.constant 0 : index
    %13 = vector.load %arg4[%c0_6, %c0_7] : memref<176x320xbf16, #tpu.memory_space<vmem>>, vector<176x320xbf16>
    %cst_8 = arith.constant dense<0.000000e+00> : vector<104x320xf32>
    %14 = tpu.matmul %12, %13, %cst_8 {dimension_numbers = #tpu.dot_dimension_numbers<[1], [0], [0], [1], [0, 0, 1, 1], [], []>} : vector<104x176xbf16>, vector<176x320xbf16>, vector<104x320xf32> -> vector<104x320xf32>
    %15 = vector.extract_strided_slice %14 {offsets = [0, 0], sizes = [104, 160], strides = [1, 1]} : vector<104x320xf32> to vector<104x160xf32>
    %16 = vector.extract_strided_slice %14 {offsets = [0, 160], sizes = [104, 160], strides = [1, 1]} : vector<104x320xf32> to vector<104x160xf32>
    %17 = arith.maximumf %15, %16 : vector<104x160xf32>
    %c0_9 = arith.constant 0 : index
    %c0_10 = arith.constant 0 : index
    %18 = vector.load %arg5[%c0_9, %c0_10] : memref<1x160xf32, #tpu.memory_space<vmem>>, vector<1x160xf32>
    %19 = vector.broadcast %18 : vector<1x160xf32> to vector<104x160xf32>
    %20 = arith.addf %17, %19 : vector<104x160xf32>
    %cst_11 = arith.constant 0.000000e+00 : f32
    %21 = vector.broadcast %cst_11 : f32 to vector<104x160xf32>
    %22 = arith.maximumf %20, %21 : vector<104x160xf32>
    %23 = arith.truncf %22 : vector<104x160xf32> to vector<104x160xbf16>
    %c0_12 = arith.constant 0 : index
    %c0_13 = arith.constant 0 : index
    %24 = vector.load %arg6[%c0_12, %c0_13] : memref<160x64xbf16, #tpu.memory_space<vmem>>, vector<160x64xbf16>
    %cst_14 = arith.constant dense<0.000000e+00> : vector<104x64xf32>
    %25 = tpu.matmul %23, %24, %cst_14 {dimension_numbers = #tpu.dot_dimension_numbers<[1], [0], [0], [1], [0, 0, 1, 1], [], []>} : vector<104x160xbf16>, vector<160x64xbf16>, vector<104x64xf32> -> vector<104x64xf32>
    %26 = vector.extract_strided_slice %25 {offsets = [0, 0], sizes = [104, 32], strides = [1, 1]} : vector<104x64xf32> to vector<104x32xf32>
    %27 = vector.extract_strided_slice %25 {offsets = [0, 32], sizes = [104, 32], strides = [1, 1]} : vector<104x64xf32> to vector<104x32xf32>
    %28 = arith.maximumf %26, %27 : vector<104x32xf32>
    %c0_15 = arith.constant 0 : index
    %c0_16 = arith.constant 0 : index
    %29 = vector.load %arg7[%c0_15, %c0_16] : memref<1x32xf32, #tpu.memory_space<vmem>>, vector<1x32xf32>
    %30 = vector.broadcast %29 : vector<1x32xf32> to vector<104x32xf32>
    %31 = arith.addf %28, %30 : vector<104x32xf32>
    %cst_17 = arith.constant 0.000000e+00 : f32
    %32 = vector.broadcast %cst_17 : f32 to vector<104x32xf32>
    %33 = arith.maximumf %31, %32 : vector<104x32xf32>
    %34 = arith.truncf %33 : vector<104x32xf32> to vector<104x32xbf16>
    %c0_18 = arith.constant 0 : index
    %c0_19 = arith.constant 0 : index
    %35 = vector.load %arg8[%c0_18, %c0_19] : memref<32x128xbf16, #tpu.memory_space<vmem>>, vector<32x128xbf16>
    %cst_20 = arith.constant dense<0.000000e+00> : vector<104x128xf32>
    %36 = tpu.matmul %34, %35, %cst_20 {dimension_numbers = #tpu.dot_dimension_numbers<[1], [0], [0], [1], [0, 0, 1, 1], [], []>} : vector<104x32xbf16>, vector<32x128xbf16>, vector<104x128xf32> -> vector<104x128xf32>
    %c0_21 = arith.constant 0 : index
    %c0_22 = arith.constant 0 : index
    %37 = vector.load %arg9[%c0_21, %c0_22] : memref<1x128xf32, #tpu.memory_space<vmem>>, vector<1x128xf32>
    %38 = vector.broadcast %37 : vector<1x128xf32> to vector<104x128xf32>
    %39 = arith.addf %36, %38 : vector<104x128xf32>
    %cst_23 = arith.constant 0.000000e+00 : f32
    %40 = vector.broadcast %cst_23 : f32 to vector<104x128xf32>
    %41 = arith.maximumf %39, %40 : vector<104x128xf32>
    %42 = arith.truncf %41 : vector<104x128xf32> to vector<104x128xbf16>
    %c0_24 = arith.constant 0 : index
    %c0_25 = arith.constant 0 : index
    %43 = vector.load %arg10[%c0_24, %c0_25] : memref<128x128xbf16, #tpu.memory_space<vmem>>, vector<128x128xbf16>
    %cst_26 = arith.constant dense<0.000000e+00> : vector<104x128xf32>
    %44 = tpu.matmul %42, %43, %cst_26 {dimension_numbers = #tpu.dot_dimension_numbers<[1], [0], [0], [1], [0, 0, 1, 1], [], []>} : vector<104x128xbf16>, vector<128x128xbf16>, vector<104x128xf32> -> vector<104x128xf32>
    %c0_27 = arith.constant 0 : index
    %c0_28 = arith.constant 0 : index
    %45 = vector.load %arg11[%c0_27, %c0_28] : memref<1x128xf32, #tpu.memory_space<vmem>>, vector<1x128xf32>
    %46 = vector.broadcast %45 : vector<1x128xf32> to vector<104x128xf32>
    %47 = arith.addf %44, %46 : vector<104x128xf32>
    %c0_29 = arith.constant 0 : index
    %c0_30 = arith.constant 0 : index
    %48 = vector.load %arg12[%c0_29, %c0_30] : memref<104x128xf32, #tpu.memory_space<vmem>>, vector<104x128xf32>
    tpu.vector_store %arg12[%c0_29, %c0_30], %47 {strides = array<i32>} : memref<104x128xf32, #tpu.memory_space<vmem>>, vector<104x128xf32>,
    return
  }
  func.func @transform_0(%arg0: i32) -> (i32, i32) {
    %c0_i32 = arith.constant 0 : i32
    %c0_i32_0 = arith.constant 0 : i32
    return %arg0, %c0_i32 : i32, i32
  }
  func.func @transform_1(%arg0: i32) -> (i32, i32) {
    %c0_i32 = arith.constant 0 : i32
    %c0_i32_0 = arith.constant 0 : i32
    %c0_i32_1 = arith.constant 0 : i32
    return %c0_i32, %c0_i32_0 : i32, i32
  }
  func.func @transform_2(%arg0: i32) -> (i32, i32) {
    %c0_i32 = arith.constant 0 : i32
    %c0_i32_0 = arith.constant 0 : i32
    %c0_i32_1 = arith.constant 0 : i32
    return %c0_i32, %c0_i32_0 : i32, i32
  }
  func.func @transform_3(%arg0: i32) -> (i32, i32) {
    %c0_i32 = arith.constant 0 : i32
    %c0_i32_0 = arith.constant 0 : i32
    %c0_i32_1 = arith.constant 0 : i32
    return %c0_i32, %c0_i32_0 : i32, i32
  }
  func.func @transform_4(%arg0: i32) -> (i32, i32) {
    %c0_i32 = arith.constant 0 : i32
    %c0_i32_0 = arith.constant 0 : i32
    %c0_i32_1 = arith.constant 0 : i32
    return %c0_i32, %c0_i32_0 : i32, i32
  }
  func.func @transform_5(%arg0: i32) -> (i32, i32) {
    %c0_i32 = arith.constant 0 : i32
    %c0_i32_0 = arith.constant 0 : i32
    %c0_i32_1 = arith.constant 0 : i32
    return %c0_i32, %c0_i32_0 : i32, i32
  }
  func.func @transform_6(%arg0: i32) -> (i32, i32) {
    %c0_i32 = arith.constant 0 : i32
    %c0_i32_0 = arith.constant 0 : i32
    %c0_i32_1 = arith.constant 0 : i32
    return %c0_i32, %c0_i32_0 : i32, i32
  }
  func.func @transform_7(%arg0: i32) -> (i32, i32) {
    %c0_i32 = arith.constant 0 : i32
    %c0_i32_0 = arith.constant 0 : i32
    %c0_i32_1 = arith.constant 0 : i32
    return %c0_i32, %c0_i32_0 : i32, i32
  }
  func.func @transform_8(%arg0: i32) -> (i32, i32) {
    %c0_i32 = arith.constant 0 : i32
    %c0_i32_0 = arith.constant 0 : i32
    %c0_i32_1 = arith.constant 0 : i32
    return %c0_i32, %c0_i32_0 : i32, i32
  }
  func.func @transform_9(%arg0: i32) -> (i32, i32) {
    %c0_i32 = arith.constant 0 : i32
    %c0_i32_0 = arith.constant 0 : i32
    %c0_i32_1 = arith.constant 0 : i32
    return %c0_i32, %c0_i32_0 : i32, i32
  }
  func.func @transform_10(%arg0: i32) -> (i32, i32) {
    %c0_i32 = arith.constant 0 : i32
    %c0_i32_0 = arith.constant 0 : i32
    %c0_i32_1 = arith.constant 0 : i32
    return %c0_i32, %c0_i32_0 : i32, i32
  }
  func.func @transform_11(%arg0: i32) -> (i32, i32) {
    %c0_i32 = arith.constant 0 : i32
    %c0_i32_0 = arith.constant 0 : i32
    return %arg0, %c0_i32 : i32, i32
  }
}

</mosaic_0001>

<bundles_post_ra>
// kernel: forward.1
= control target key start
LH: loop header
LB: loop body
LE: loop exit
PB: predicated region body
PF: predicated region fallthrough
CT: control target
= control target key end

     0   :  { %s2648_s17 = smov 0   ;;  %s3452_s0 = inlined_call_operand.vmem [shape: f32[312,23], index: 0, kind: input, shape index: {}]   ;;  %s3453_s1 = inlined_call_operand.vmem [shape: bf16[23,352], index: 1, kind: input, shape index: {}]   ;;  %s3454_s2 = inlined_call_operand.vmem [shape: f32[1,176], index: 2, kind: input, shape index: {}]   ;;  %s3455_s3 = inlined_call_operand.vmem [shape: bf16[176,320], index: 3, kind: input, shape index: {}]   ;;  %s3456_s4 = inlined_call_operand.vmem [shape: f32[1,160], index: 4, kind: input, shape index: {}]   ;;  %s3457_s5 = inlined_call_operand.vmem [shape: bf16[160,64], index: 5, kind: input, shape index: {}]   ;;  %s3458_s6 = inlined_call_operand.vmem [shape: f32[1,32], index: 6, kind: input, shape index: {}]   ;;  %s3459_s7 = inlined_call_operand.vmem [shape: bf16[32,128], index: 7, kind: input, shape index: {}]   ;;  %s3460_s8 = inlined_call_operand.vmem [shape: f32[1,128], index: 8, kind: input, shape index: {}]   ;;  %s3461_s9 = inlined_call_operand.vmem [shape: bf16[128,128], index: 9, kind: input, shape index: {}]   ;;  %s3462_s10 = inlined_call_operand.vmem [shape: f32[1,128], index: 10, kind: input, shape index: {}]   ;;  %s3463_s11 = inlined_call_operand.vmem [shape: f32[312,128], index: 11, kind: output, shape index: {}]  }
   0x1 LB: > { %s2215_s18 = sadd.s32 4294967295, %s2580_s17   ;;  %p2219_p0 = scmp.ge.s32.totalorder %s2580_s17, 1  ;;  %s2580_s17 = sphi %s2648_s17, %s21_s17  }
   0x2   : > { %p338_p1 = scmp.lt.s32.totalorder %s2580_s17, 4 }
   0x4   : > { %p339_p2 = pnand %p2219_p0, %p338_p1 }
   0x5   : > { %v2503_v0 = vld [vmem:[%s3453_s1 + $0x4] ss:$12 sps:$4 sm:$0xff] (!%p339_p2)   ;;  %vm463_vm0 = vcmask (!%p339_p2), 1042432   ;;  %v2582_v1 = vmov (!%p339_p2), 0.0   ;;  %v2505_v2 = vld [vmem:[%s3453_s1] ss:$12 sps:$4 sm:$0xff] (!%p339_p2)  }
   0x6   : > { %342 = sbr.rel (%p339_p2) target bundleno = 1522 (0x5f2), region = 64  ;;  %2361 = vmatprep.subr.bf16.mxu1 (!%p339_p2), %v2582_v1  ;;  %476 = vmatprep.subr.bf16.mxu0 (!%p339_p2), %v2503_v0  ;;  %v2506_v3 = vld [vmem:[%s3453_s1 + $0x8] ss:$12 sps:$4 sm:$0xff] (!%p339_p2)   ;;  %v415_v4 = vld [vmem:[%s3453_s1 + $0x18] sm:$0xff] (!%p339_p2)  ;;  %vm464_vm1 = vcmask (!%p339_p2), 1043456   ;;  %v2583_v6 = vmov (!%p339_p2), 65535  }
   0x7   : > { %477 = vmatpush1.bf16.msra.mxu0 (!%p339_p2), %v2505_v2  ;;  %v2226_v5 = vcombine.high (!%p339_p2), %v415_v4, %v415_v4  ;;  %v465_v7 = vsel (!%p339_p2), %vm463_vm0, 4294967295, %v2583_v6  ;;  %v2225_v8 = vcombine.low (!%p339_p2), %v415_v4, %v415_v4  ;;  %v2509_v9 = vld [vmem:[%s3453_s1 + $0x20] ss:$0 sps:$4 sm:$0xff] (!%p339_p2)   ;;  %v2584_v10 = vmov (!%p339_p2), 0   ;;  %2362 = vmatpush3.bf16.msra.mxu1 (!%p339_p2), %v2506_v3  ;;  %s378_s29 = smul.u32 (!%p339_p2), 13, %s2215_s18  ;;  %s2586_s18 = smov (!%p339_p2), 80  }
   0x8   : > { %508 = vmatprep.mubr.bf16.mxu0 (!%p339_p2), %v2584_v10  ;;  %v466_v11 = vsel (!%p339_p2), %vm464_vm1, %v465_v7, 0  ;;  %vm2585_vm2 = vmmov (!%p339_p2), 0   ;;  %2363 = vmatprep.subr.bf16.mxu1 (!%p339_p2), %v2582_v1  ;;  %vm441_vm3 = vcmask (!%p339_p2), 187392   ;;  %v2510_v35 = vld [vmem:[%s3455_s3] ss:$12 sps:$4 sm:$0xff] (!%p339_p2)   ;;  %vm743_vm4 = vcmask (!%p339_p2), 654336  }
   0x9   : > { %2365 = vmatprep.mubr.msk.bf16.mxu1 (!%p339_p2), %vm2585_vm2, %v2582_v1  ;;  %v471_v12 = vand.u32 (!%p339_p2), %v2226_v5, %v466_v11  ;;  %v468_v13 = vand.u32 (!%p339_p2), %v2225_v8, %v466_v11  ;;  %v474_v14 = vand.u32 (!%p339_p2), %v2509_v9, %v466_v11  ;;  %p379_p3 = scmp.lt.s32.totalorder (!%p339_p2), %s378_s29, 38  ;;  %v2512_v36 = vld [vmem:[%s3455_s3 + $0x4] ss:$12 sps:$4 sm:$0xff] (!%p339_p2)   ;;  %v2513_v37 = vld [vmem:[%s3455_s3 + $0x8] ss:$12 sps:$4 sm:$0xff] (!%p339_p2)   ;;  %vm1107_vm5 = vcmask (!%p339_p2), 392192  }
   0xa   : > { %v2516_v38 = vld [vmem:[%s3455_s3 + $0x1c] ss:$12 sps:$4 sm:$0xff] (!%p339_p2)   ;;  %v2517_v39 = vld [vmem:[%s3455_s3 + $0x20] ss:$12 sps:$4 sm:$0xff] (!%p339_p2)   ;;  %v2514_v40 = vld [vmem:[%s3455_s3 + $0x18] ss:$12 sps:$4 sm:$0xff] (!%p339_p2)  }
   0xb   : > { %478 = vmatprep.subr.bf16.mxu0 (!%p339_p2), %v471_v12  ;;  %2364 = vmatpush3.bf16.msra.mxu1 (!%p339_p2), %v474_v14  ;;  %v2520_v41 = vld [vmem:[%s3455_s3 + $0x34] ss:$12 sps:$4 sm:$0xff] (!%p339_p2)   ;;  %v2521_v42 = vld [vmem:[%s3455_s3 + $0x38] ss:$12 sps:$4 sm:$0xff] (!%p339_p2)   ;;  %v2518_v43 = vld [vmem:[%s3455_s3 + $0x30] ss:$12 sps:$4 sm:$0xff] (!%p339_p2)  }
   0xc   : > { %479 = vmatpush1.bf16.msra.mxu0 (!%p339_p2), %v468_v13  ;;  %1230 = vmatprep.subr.bf16.mxu1 (!%p339_p2), %v2584_v10  ;;  %v2524_v44 = vld [vmem:[%s3455_s3 + $0x4c] ss:$12 sps:$4 sm:$0xff] (!%p339_p2)   ;;  %v2525_v45 = vld [vmem:[%s3455_s3 + $0x50] ss:$12 sps:$4 sm:$0xff] (!%p339_p2)   ;;  %v2522_v46 = vld [vmem:[%s3455_s3 + $0x48] ss:$12 sps:$4 sm:$0xff] (!%p339_p2)  }
   0xd   : > { %s3465_s29 = smov (!%p379_p3, %s378_s29), 38  ;;  %1129 = vmatprep.subr.bf16.mxu0 %v2512_v36  ;;  %v2528_v47 = vld [vmem:[%s3455_s3 + $0x64] ss:$12 sps:$4 sm:$0xff]   ;;  %v2529_v48 = vld [vmem:[%s3455_s3 + $0x68] ss:$12 sps:$4 sm:$0xff]   ;;  %s2587_s25 = smov 96  }
   0xe   : > { %s2220_s30 = sshll.u32 %s3465_s29, 3  ;;  %v2526_v49 = vld [vmem:[%s3455_s3 + $0x60] ss:$12 sps:$4 sm:$0xff]   ;;  %v2532_v50 = vld [vmem:[%s3455_s3 + $0x7c] ss:$12 sps:$4 sm:$0xff]   ;;  %vm1396_vm6 = vcmask 785408  }
   0xf   : > { %s2685_s14 = scalar_lea.vmem %s3452_s0, %s2220_s30  ;;  %v2533_v51 = vld [vmem:[%s3455_s3 + $0x80] ss:$12 sps:$4 sm:$0xff]   ;;  %v2530_v52 = vld [vmem:[%s3455_s3 + $0x78] ss:$12 sps:$4 sm:$0xff]   ;;  %v2534_v55 = vld [vmem:[%s3455_s3 + $0x90] ss:$12 sps:$4 sm:$0xff]   ;;  %s3434_s24 = scalar_lea.vmem %s3463_s11, %s2220_s30 }
  0x10   : > { %v391_v15 = vld [vmem:[%s2685_s14] sm:$0xff]  ;;  %v392_v16 = vld [vmem:[%s2685_s14 + $0x8] sm:$0xff]  ;;  %v393_v18 = vld [vmem:[%s2685_s14 + $0x10] sm:$0xff]  ;;  %vm1620_vm7 = vcmask 261120  }
  0x11   : > { %v404_v17 = vpack.c.bf16 %v392_v16, %v391_v15  ;;  %v394_v19 = vld [vmem:[%s2685_s14 + $0x18] sm:$0xff]  ;;  %v395_v21 = vld [vmem:[%s2685_s14 + $0x20] sm:$0xff]  ;;  %v396_v22 = vld [vmem:[%s2685_s14 + $0x28] sm:$0xff] }
  0x12   : > { %v405_v20 = vpack.c.bf16 %v394_v19, %v393_v18  ;;  %v406_v23 = vpack.c.bf16 %v396_v22, %v395_v21  ;;  %v397_v24 = vld [vmem:[%s2685_s14 + $0x30] sm:$0xff]  ;;  %v398_v25 = vld [vmem:[%s2685_s14 + $0x38] sm:$0xff]  ;;  %v399_v27 = vld [vmem:[%s2685_s14 + $0x40] sm:$0xff] }
  0x13   : > { %2228 = vmatmul.mubr.msk.bf16.vlgmr.msra.gmra.mrb[0].mxu0 %vm441_vm3, %v404_v17  ;;  %2366 = vmatmul.mubr.msk.bf16.vlgmr.msra.gmra.mrb[0].mxu1 %vm441_vm3, %v404_v17  ;;  %v407_v26 = vpack.c.bf16 %v398_v25, %v397_v24  ;;  %v400_v28 = vld [vmem:[%s2685_s14 + $0x48] sm:$0xff]  ;;  %v401_v30 = vld [vmem:[%s2685_s14 + $0x50] sm:$0xff]  ;;  %v402_v31 = vld [vmem:[%s2685_s14 + $0x58] sm:$0xff] }
  0x14   : > { %518 = vmatprep.mubr.bf16.mxu0 %v2584_v10  ;;  %2369 = vmatprep.mubr.msk.bf16.mxu1 %vm2585_vm2, %v2582_v1  ;;  %v408_v29 = vpack.c.bf16 %v400_v28, %v399_v27  ;;  %v409_v32 = vpack.c.bf16 %v402_v31, %v401_v30  ;;  %v403_v33 = vld [vmem:[%s2685_s14 + $0x60] sm:$0xff]  ;;  %v2540_v56 = vld [vmem:[%s3455_s3 + $0xac] ss:$12 sps:$4 sm:$0xff]   ;;  %v2541_v57 = vld [vmem:[%s3455_s3 + $0xb0] ss:$12 sps:$4 sm:$0xff]  }
  0x15   : > { %v410_v34 = vpack.c.bf16 %v403_v33, %v403_v33  ;;  %1231 = vmatpush1.bf16.msra.mxu1 %v2513_v37  ;;  %1130 = vmatpush1.bf16.msra.mxu0 %v2510_v35  ;;  %v2536_v53 = vld [vmem:[%s3455_s3 + $0x94] ss:$12 sps:$4 sm:$0xff]   ;;  %v2537_v54 = vld [vmem:[%s3455_s3 + $0x98] ss:$12 sps:$4 sm:$0xff]   ;;  %v2548_v62 = vld [vmem:[%s3455_s3 + $0xdc] ss:$12 sps:$4 sm:$0xff]  }
  0x16   : > { %1232 = vmatprep.subr.bf16.mxu1 %v2584_v10  ;;  %1131 = vmatprep.subr.bf16.mxu0 %v2516_v38  ;;  %v2538_v58 = vld [vmem:[%s3455_s3 + $0xa8] ss:$12 sps:$4 sm:$0xff]   ;;  %v2544_v59 = vld [vmem:[%s3455_s3 + $0xc4] ss:$12 sps:$4 sm:$0xff]   ;;  %v2542_v60 = vld [vmem:[%s3455_s3 + $0xc0] ss:$12 sps:$4 sm:$0xff]  }
  0x17   : > { %v2545_v61 = vld [vmem:[%s3455_s3 + $0xc8] ss:$12 sps:$4 sm:$0xff]   ;;  %v2546_v63 = vld [vmem:[%s3455_s3 + $0xd8] ss:$12 sps:$4 sm:$0xff]   ;;  %v2549_v0 = vld [vmem:[%s3455_s3 + $0xe0] ss:$12 sps:$4 sm:$0xff]  }
  0x18   : > { %v2552_v2 = vld [vmem:[%s3455_s3 + $0xf4] ss:$12 sps:$4 sm:$0xff]   ;;  %v2550_v3 = vld [vmem:[%s3455_s3 + $0xf0] ss:$12 sps:$4 sm:$0xff]   ;;  %v2553_v4 = vld [vmem:[%s3455_s3 + $0xf8] ss:$12 sps:$4 sm:$0xff]  }
  0x19   : > { %1233 = vmatpush1.bf16.msra.mxu1 %v2517_v39  ;;  %1132 = vmatpush1.bf16.msra.mxu0 %v2514_v40 }
  0x1a   : > { %1234 = vmatprep.subr.bf16.mxu1 %v2584_v10  ;;  %1133 = vmatprep.subr.bf16.mxu0 %v2520_v41 }
  0x1b   : > { %2229 = vmatmul.mubr.msk.bf16.gmra.mrb[4].mxu0 %vm441_vm3, %v405_v20  ;;  %2370 = vmatmul.mubr.msk.bf16.gmra.mrb[4].mxu1 %vm441_vm3, %v405_v20 }
  0x1c   : > { %528 = vmatprep.mubr.bf16.mxu0 %v2584_v10  ;;  %2373 = vmatprep.mubr.msk.bf16.mxu1 %vm2585_vm2, %v2582_v1 }
  0x1d   : > { %1235 = vmatpush1.bf16.msra.mxu1 %v2521_v42  ;;  %1134 = vmatpush1.bf16.msra.mxu0 %v2518_v43 }
  0x1e   : > { %1236 = vmatprep.subr.bf16.mxu1 %v2584_v10  ;;  %1135 = vmatprep.subr.bf16.mxu0 %v2524_v44 }
  0x21   : > { %1237 = vmatpush1.bf16.msra.mxu1 %v2525_v45  ;;  %1136 = vmatpush1.bf16.msra.mxu0 %v2522_v46 }
  0x22   : > { %1238 = vmatprep.subr.bf16.mxu1 %v2584_v10  ;;  %1137 = vmatprep.subr.bf16.mxu0 %v2528_v47 }
  0x23   : > { %2230 = vmatmul.mubr.msk.bf16.gmra.mrb[8].mxu0 %vm441_vm3, %v406_v23  ;;  %2374 = vmatmul.mubr.msk.bf16.gmra.mrb[8].mxu1 %vm441_vm3, %v406_v23 }
  0x24   : > { %538 = vmatprep.mubr.bf16.mxu0 %v2584_v10  ;;  %2377 = vmatprep.mubr.msk.bf16.mxu1 %vm2585_vm2, %v2582_v1 }
  0x25   : > { %1239 = vmatpush1.bf16.msra.mxu1 %v2529_v48  ;;  %1138 = vmatpush1.bf16.msra.mxu0 %v2526_v49 }
  0x26   : > { %1240 = vmatprep.subr.bf16.mxu1 %v2584_v10  ;;  %1139 = vmatprep.subr.bf16.mxu0 %v2532_v50 }
  0x29   : > { %1241 = vmatpush1.bf16.msra.mxu1 %v2533_v51  ;;  %1140 = vmatpush1.bf16.msra.mxu0 %v2530_v52 }
  0x2a   : > { %1242 = vmatprep.subr.bf16.mxu1 %v2584_v10  ;;  %1141 = vmatprep.subr.bf16.mxu0 %v2536_v53 }
  0x2b   : > { %2231 = vmatmul.mubr.msk.bf16.gmra.mrb[12].mxu0 %vm441_vm3, %v407_v26  ;;  %2378 = vmatmul.mubr.msk.bf16.gmra.mrb[12].mxu1 %vm441_vm3, %v407_v26 }
  0x2c   : > { %548 = vmatprep.mubr.bf16.mxu0 %v2584_v10  ;;  %2381 = vmatprep.mubr.msk.bf16.mxu1 %vm2585_vm2, %v2582_v1 }
  0x2d   : > { %1243 = vmatpush1.bf16.msra.mxu1 %v2537_v54  ;;  %1142 = vmatpush1.bf16.msra.mxu0 %v2534_v55 }
  0x2e   : > { %1244 = vmatprep.subr.bf16.mxu1 %v2584_v10  ;;  %1143 = vmatprep.subr.bf16.mxu0 %v2540_v56 }
  0x31   : > { %1245 = vmatpush1.bf16.msra.mxu1 %v2541_v57  ;;  %1144 = vmatpush1.bf16.msra.mxu0 %v2538_v58 }
  0x32   : > { %1246 = vmatprep.subr.bf16.mxu1 %v2584_v10  ;;  %1145 = vmatprep.subr.bf16.mxu0 %v2544_v59 }
  0x33   : > { %2232 = vmatmul.mubr.msk.bf16.gmra.mrb[16].mxu0 %vm441_vm3, %v408_v29  ;;  %2382 = vmatmul.mubr.msk.bf16.gmra.mrb[16].mxu1 %vm441_vm3, %v408_v29 }
  0x34   : > { %558 = vmatprep.mubr.bf16.mxu0 %v2584_v10  ;;  %2385 = vmatprep.mubr.msk.bf16.mxu1 %vm2585_vm2, %v2582_v1 }
  0x35   : > { %1146 = vmatpush1.bf16.msra.mxu0 %v2542_v60  ;;  %1247 = vmatpush1.bf16.msra.mxu1 %v2545_v61 }
  0x36   : > { %1248 = vmatprep.subr.bf16.mxu1 %v2584_v10  ;;  %1147 = vmatprep.subr.bf16.mxu0 %v2548_v62  ;;  %v811_v62 = vlaneseq }
  0x39   : > { %1148 = vmatpush1.bf16.msra.mxu0 %v2546_v63  ;;  %1249 = vmatpush1.bf16.msra.mxu1 %v2549_v0  ;;  %v2934_v63 = vshrl.u32 %v811_v62, 7 }
  0x3a   : > { %1250 = vmatprep.subr.bf16.mxu1 %v2584_v10  ;;  %1149 = vmatprep.subr.bf16.mxu0 %v2552_v2  ;;  %v809_v2 = vld [vmem:[%s3454_s2] sm:$0x3] }
  0x3b   : > { %2233 = vmatmul.mubr.msk.bf16.gmra.mrb[20].mxu0 %vm441_vm3, %v409_v32  ;;  %2386 = vmatmul.mubr.msk.bf16.gmra.mrb[20].mxu1 %vm441_vm3, %v409_v32  ;;  %v817_v0 = vsub.s32 1, %v2934_v63 }
  0x3c   : > { %568 = vmatprep.mubr.bf16.mxu0 %v2584_v10  ;;  %2389 = vmatprep.mubr.msk.bf16.mxu1 %vm2585_vm2, %v2582_v1 }
  0x3d   : > { %1150 = vmatpush1.bf16.msra.mxu0 %v2550_v3  ;;  %1251 = vmatpush1.bf16.msra.mxu1 %v2553_v4  ;;  %v2942_v3 = vrot.slane %v809_v2, %v817_v0 }
  0x3e   : > { %1642 = vmatprep.subr.bf16.mxu0 %v2584_v10  ;;  %2469 = vmatprep.subr.bf16.mxu1 %v2584_v10 }
  0x43   : > { %2234 = vmatmul.mubr.msk.bf16.gmra.mrb[24].mxu0 %vm441_vm3, %v410_v34  ;;  %2390 = vmatmul.mubr.msk.bf16.gmra.mrb[24].mxu1 %vm441_vm3, %v410_v34 }
  0xe6   : > { %v2841_v5 = vpop.f32.mrb[0].mxu0  ;;  %v611_v6 = vpop.f32.mrb[0].mxu1 }
  0xe7   : > { %693 = vrot.lane.b32.xlu0 %v611_v6, %s2586_s18  ;;  %v2844_v7 = vpop.f32.mrb[1].mxu0  ;;  %v2367_v8 = vpop.f32.mrb[1].mxu1  ;;  %v813_v6 = vsub.s32 0, %v2934_v63 }
  0xe8   : > { %v2847_v9 = vpop.f32.mrb[2].mxu0  ;;  %v614_v11 = vpop.f32.mrb[2].mxu1 }
  0xe9   : > { %697 = vrot.lane.b32.xlu1 %v614_v11, %s2586_s18  ;;  %v2851_v12 = vpop.f32.mrb[3].mxu0  ;;  %v2368_v13 = vpop.f32.mrb[3].mxu1 }
  0xeb   : > { %691 = vrot.lane.b32.xlu0 %v2844_v7, %s2586_s18 }
  0xed   : > { %695 = vrot.lane.b32.xlu1 %v2851_v12, %s2586_s18 }
  0xee   : > { %v2857_v14 = vpop.f32.mrb[4].mxu0  ;;  %v619_v15 = vpop.f32.mrb[4].mxu1 }
  0xef   : > { %v2859_v16 = vpop.f32.mrb[5].mxu0  ;;  %v2371_v17 = vpop.f32.mrb[5].mxu1 }
  0xf0   : > { %v622_v18 = vpop.f32.mrb[6].mxu1  ;;  %699 = vrot.lane.b32.xlu0 %v2859_v16, %s2586_s18  ;;  %v2863_v19 = vpop.f32.mrb[6].mxu0  ;;  %v2950_v17 = vrot.slane %v809_v2, %v813_v6 }
  0xf1   : > { %v2372_v20 = vpop.f32.mrb[7].mxu1  ;;  %701 = vrot.lane.b32.xlu1 %v619_v15, %s2586_s18  ;;  %v2866_v21 = vpop.f32.mrb[7].mxu0 }
  0xf4   : > { %703 = vrot.lane.b32.xlu0 %v2866_v21, %s2586_s18 }
  0xf5   : > { %705 = vrot.lane.b32.xlu1 %v622_v18, %s2586_s18 }
  0xf6   : > { %v2871_v22 = vpop.f32.mrb[8].mxu0  ;;  %v627_v23 = vpop.f32.mrb[8].mxu1 }
  0xf7   : > { %v2873_v24 = vpop.f32.mrb[9].mxu0  ;;  %v2375_v25 = vpop.f32.mrb[9].mxu1 }
  0xf8   : > { %v630_v26 = vpop.f32.mrb[10].mxu1  ;;  %707 = vrot.lane.b32.xlu0 %v2873_v24, %s2586_s18  ;;  %v2877_v27 = vpop.f32.mrb[10].mxu0 }
  0xf9   : > { %v2376_v28 = vpop.f32.mrb[11].mxu1  ;;  %709 = vrot.lane.b32.xlu1 %v627_v23, %s2586_s18  ;;  %v2880_v29 = vpop.f32.mrb[11].mxu0 }
  0xfc   : > { %711 = vrot.lane.b32.xlu0 %v2880_v29, %s2586_s18 }
  0xfd   : > { %713 = vrot.lane.b32.xlu1 %v630_v26, %s2586_s18 }
  0xfe   : > { %v2885_v30 = vpop.f32.mrb[12].mxu0  ;;  %v635_v31 = vpop.f32.mrb[12].mxu1 }
  0xff   : > { %v2887_v32 = vpop.f32.mrb[13].mxu0  ;;  %v2379_v33 = vpop.f32.mrb[13].mxu1 }
 0x100   : > { %v638_v34 = vpop.f32.mrb[14].mxu1  ;;  %715 = vrot.lane.b32.xlu0 %v2887_v32, %s2586_s18  ;;  %v2891_v35 = vpop.f32.mrb[14].mxu0 }
 0x101   : > { %v2380_v36 = vpop.f32.mrb[15].mxu1  ;;  %717 = vrot.lane.b32.xlu1 %v635_v31, %s2586_s18  ;;  %v2894_v37 = vpop.f32.mrb[15].mxu0 }
 0x104   : > { %719 = vrot.lane.b32.xlu0 %v2894_v37, %s2586_s18 }
 0x105   : > { %721 = vrot.lane.b32.xlu1 %v638_v34, %s2586_s18 }
 0x106   : > { %v2899_v38 = vpop.f32.mrb[16].mxu0  ;;  %v643_v39 = vpop.f32.mrb[16].mxu1 }
 0x107   : > { %v2901_v40 = vpop.f32.mrb[17].mxu0  ;;  %v2383_v41 = vpop.f32.mrb[17].mxu1 }
 0x108   : > { %v646_v42 = vpop.f32.mrb[18].mxu1  ;;  %723 = vrot.lane.b32.xlu0 %v2901_v40, %s2586_s18  ;;  %v2905_v43 = vpop.f32.mrb[18].mxu0 }
 0x109   : > { %v2384_v44 = vpop.f32.mrb[19].mxu1  ;;  %725 = vrot.lane.b32.xlu1 %v643_v39, %s2586_s18  ;;  %v2908_v45 = vpop.f32.mrb[19].mxu0 }
 0x10c   : > { %727 = vrot.lane.b32.xlu0 %v2908_v45, %s2586_s18 }
 0x10d   : > { %729 = vrot.lane.b32.xlu1 %v646_v42, %s2586_s18 }
 0x10e   : > { %v2913_v46 = vpop.f32.mrb[20].mxu0  ;;  %v651_v47 = vpop.f32.mrb[20].mxu1 }
 0x10f   : > { %v2915_v48 = vpop.f32.mrb[21].mxu0  ;;  %v2387_v49 = vpop.f32.mrb[21].mxu1 }
 0x110   : > { %v654_v50 = vpop.f32.mrb[22].mxu1  ;;  %731 = vrot.lane.b32.xlu0 %v2915_v48, %s2586_s18  ;;  %v2919_v51 = vpop.f32.mrb[22].mxu0 }
 0x111   : > { %v2388_v52 = vpop.f32.mrb[23].mxu1  ;;  %733 = vrot.lane.b32.xlu1 %v651_v47, %s2586_s18  ;;  %v2922_v53 = vpop.f32.mrb[23].mxu0 }
 0x114   : > { %735 = vrot.lane.b32.xlu0 %v2922_v53, %s2586_s18 }
 0x115   : > { %737 = vrot.lane.b32.xlu1 %v654_v50, %s2586_s18 }
 0x116   : > { %v2927_v54 = vpop.f32.mrb[24].mxu0  ;;  %v659_v55 = vpop.f32.mrb[24].mxu1 }
 0x117   : > { %v2929_v56 = vpop.f32.mrb[25].mxu0  ;;  %v2391_v57 = vpop.f32.mrb[25].mxu1 }
 0x118   : > { %739 = vrot.lane.b32.xlu0 %v2929_v56, %s2586_s18  ;;  %v574_v58 = vpop.f32.mrb[26].mxu0  ;;  %v662_v59 = vpop.f32.mrb[26].mxu1 }
 0x119   : > { %741 = vrot.lane.b32.xlu1 %v659_v55, %s2586_s18  ;;  %v575_v60 = vpop.f32.mrb[27].mxu0  ;;  %v2392_v61 = vpop.f32.mrb[27].mxu1 }
 0x159   : > { %v694_v4 = vpop.permute.xlu0 %693 }
 0x15a   : > { %v784_v8 = vmax.f32 %v2844_v7, %v694_v4 }
 0x15b   : > { %v698_v11 = vpop.permute.xlu1 %697 }
 0x15c   : > { %v822_v13 = vadd.f32 %v2942_v3, %v784_v8  ;;  %v786_v15 = vmax.f32 %v2851_v12, %v698_v11 }
 0x15d   : > { %v692_v18 = vpop.permute.xlu0 %691 }
 0x15e   : > { %v824_v20 = vadd.f32 %v2942_v3, %v786_v15  ;;  %v744_v23 = vsel %vm743_vm4, %v692_v18, %v694_v4  ;;  %v848_v28 = vmax.f32 %v822_v13, 0.0 }
 0x15f   : > { %v783_v25 = vmax.f32 %v2841_v5, %v744_v23  ;;  %v696_v26 = vpop.permute.xlu1 %695 }
 0x160   : > { %v850_v7 = vmax.f32 %v824_v20, 0.0  ;;  %v745_v31 = vsel %vm743_vm4, %v696_v26, %v698_v11 }
 0x161   : > { %v821_v33 = vadd.f32 %v2950_v17, %v783_v25  ;;  %v785_v12 = vmax.f32 %v2847_v9, %v745_v31 }
 0x162   : > { %v874_v34 = vpack.c.bf16 %v850_v7, %v848_v28  ;;  %v700_v36 = vpop.permute.xlu0 %699 }
 0x163   : > { %v823_v39 = vadd.f32 %v2950_v17, %v785_v12  ;;  %v702_v41 = vpop.permute.xlu1 %701  ;;  %v847_v5 = vmax.f32 %v821_v33, 0.0 }
 0x164   : > { %v746_v42 = vsel %vm743_vm4, %v700_v36, %v702_v41  ;;  %v788_v44 = vmax.f32 %v2859_v16, %v702_v41  ;;  %2275 = vmatprep.mubr.msk.bf16.mxu0 %vm1107_vm5, %v874_v34  ;;  %2282 = vmatprep.mubr.msk.bf16.mxu1 %vm1107_vm5, %v874_v34 }
 0x165   : > { %v849_v47 = vmax.f32 %v823_v39, 0.0  ;;  %v787_v49 = vmax.f32 %v2857_v14, %v746_v42 }
 0x166   : > { %v704_v50 = vpop.permute.xlu0 %703  ;;  %v826_v55 = vadd.f32 %v2942_v3, %v788_v44 }
 0x167   : > { %v873_v9 = vpack.c.bf16 %v849_v47, %v847_v5  ;;  %v706_v52 = vpop.permute.xlu1 %705  ;;  %v825_v59 = vadd.f32 %v2950_v17, %v787_v49 }
 0x168   : > { %v747_v57 = vsel %vm743_vm4, %v704_v50, %v706_v52  ;;  %v790_v58 = vmax.f32 %v2866_v21, %v706_v52  ;;  %v852_v2 = vmax.f32 %v826_v55, 0.0 }
 0x169   : > { %v789_v16 = vmax.f32 %v2863_v19, %v747_v57  ;;  %1162 = vmatmul.mubr.bf16.vlgmr.msra.gmra.mrb[28].mxu0 %v873_v9  ;;  %1263 = vmatmul.mubr.bf16.vlgmr.msra.gmra.mrb[28].mxu1 %v873_v9  ;;  %v851_v13 = vmax.f32 %v825_v59, 0.0 }
 0x16a   : > { %v828_v60 = vadd.f32 %v2942_v3, %v790_v58  ;;  %v708_v61 = vpop.permute.xlu0 %707 }
 0x16b   : > { %v827_v14 = vadd.f32 %v2950_v17, %v789_v16  ;;  %v710_v62 = vpop.permute.xlu1 %709 }
 0x16c   : > { %v854_v4 = vmax.f32 %v828_v60, 0.0  ;;  %v748_v8 = vsel %vm743_vm4, %v708_v61, %v710_v62  ;;  %v792_v11 = vmax.f32 %v2873_v24, %v710_v62 }
 0x16d   : > { %v853_v21 = vmax.f32 %v827_v14, 0.0  ;;  %v791_v15 = vmax.f32 %v2871_v22, %v748_v8 }
 0x16e   : > { %v876_v18 = vpack.c.bf16 %v854_v4, %v852_v2  ;;  %v712_v19 = vpop.permute.xlu0 %711  ;;  %v830_v25 = vadd.f32 %v2942_v3, %v792_v11 }
 0x16f   : > { %v714_v20 = vpop.permute.xlu1 %713  ;;  %v875_v23 = vpack.c.bf16 %v853_v21, %v851_v13  ;;  %v829_v24 = vadd.f32 %v2950_v17, %v791_v15 }
 0x170   : > { %v749_v26 = vsel %vm743_vm4, %v712_v19, %v714_v20  ;;  %v794_v28 = vmax.f32 %v2880_v29, %v714_v20  ;;  %2276 = vmatprep.mubr.msk.bf16.mxu0 %vm1107_vm5, %v876_v18  ;;  %2283 = vmatprep.mubr.msk.bf16.mxu1 %vm1107_vm5, %v876_v18  ;;  %v856_v34 = vmax.f32 %v830_v25, 0.0 }
 0x171   : > { %v793_v7 = vmax.f32 %v2877_v27, %v749_v26  ;;  %1172 = vmatmul.mubr.bf16.gmra.mrb[32].mxu0 %v875_v23  ;;  %1271 = vmatmul.mubr.bf16.gmra.mrb[32].mxu1 %v875_v23  ;;  %v855_v41 = vmax.f32 %v829_v24, 0.0 }
 0x172   : > { %v832_v22 = vadd.f32 %v2942_v3, %v794_v28  ;;  %v716_v31 = vpop.permute.xlu0 %715 }
 0x173   : > { %v831_v33 = vadd.f32 %v2950_v17, %v793_v7  ;;  %v718_v12 = vpop.permute.xlu1 %717 }
 0x174   : > { %v858_v36 = vmax.f32 %v832_v22, 0.0  ;;  %v750_v29 = vsel %vm743_vm4, %v716_v31, %v718_v12  ;;  %v796_v39 = vmax.f32 %v2887_v32, %v718_v12 }
 0x175   : > { %v857_v42 = vmax.f32 %v831_v33, 0.0  ;;  %v795_v44 = vmax.f32 %v2885_v30, %v750_v29 }
 0x176   : > { %v878_v5 = vpack.c.bf16 %v858_v36, %v856_v34  ;;  %v720_v27 = vpop.permute.xlu0 %719  ;;  %v834_v50 = vadd.f32 %v2942_v3, %v796_v39 }
 0x177   : > { %v722_v47 = vpop.permute.xlu1 %721  ;;  %v877_v49 = vpack.c.bf16 %v857_v42, %v855_v41  ;;  %v833_v32 = vadd.f32 %v2950_v17, %v795_v44 }
 0x178   : > { %v751_v9 = vsel %vm743_vm4, %v720_v27, %v722_v47  ;;  %v798_v52 = vmax.f32 %v2894_v37, %v722_v47  ;;  %2277 = vmatprep.mubr.msk.bf16.mxu0 %vm1107_vm5, %v878_v5  ;;  %2284 = vmatprep.mubr.msk.bf16.mxu1 %vm1107_vm5, %v878_v5  ;;  %v860_v16 = vmax.f32 %v834_v50, 0.0 }
 0x179   : > { %v797_v55 = vmax.f32 %v2891_v35, %v751_v9  ;;  %1182 = vmatmul.mubr.bf16.gmra.mrb[36].mxu0 %v877_v49  ;;  %1279 = vmatmul.mubr.bf16.gmra.mrb[36].mxu1 %v877_v49  ;;  %v859_v14 = vmax.f32 %v833_v32, 0.0 }
 0x17a   : > { %v836_v30 = vadd.f32 %v2942_v3, %v798_v52  ;;  %v724_v57 = vpop.permute.xlu0 %723 }
 0x17b   : > { %v835_v58 = vadd.f32 %v2950_v17, %v797_v55  ;;  %v726_v59 = vpop.permute.xlu1 %725 }
 0x17c   : > { %v862_v60 = vmax.f32 %v836_v30, 0.0  ;;  %v752_v37 = vsel %vm743_vm4, %v724_v57, %v726_v59  ;;  %v800_v61 = vmax.f32 %v2901_v40, %v726_v59  ;;  %v2557_v59 = vld [vmem:[%s3457_s5 + $0x18] sm:$0xff]  }
 0x17d   : > { %v861_v62 = vmax.f32 %v835_v58, 0.0  ;;  %v799_v2 = vmax.f32 %v2899_v38, %v752_v37  ;;  %v2556_v58 = vld [vmem:[%s3457_s5 + $0x10] sm:$0xff]  }
 0x17e   : > { %v880_v4 = vpack.c.bf16 %v862_v60, %v860_v16  ;;  %v728_v35 = vpop.permute.xlu0 %727  ;;  %v838_v13 = vadd.f32 %v2942_v3, %v800_v61  ;;  %v2558_v16 = vld [vmem:[%s3457_s5 + $0x20] sm:$0xff]   ;;  %v2559_v60 = vld [vmem:[%s3457_s5 + $0x28] sm:$0xff]   ;;  %v2560_v37 = vld [vmem:[%s3457_s5 + $0x30] sm:$0xff]  }
 0x17f   : > { %v730_v8 = vpop.permute.xlu1 %729  ;;  %v879_v11 = vpack.c.bf16 %v861_v62, %v859_v14  ;;  %v837_v40 = vadd.f32 %v2950_v17, %v799_v2  ;;  %v2561_v61 = vld [vmem:[%s3457_s5 + $0x38] sm:$0xff]   ;;  %v2562_v14 = vld [vmem:[%s3457_s5 + $0x40] sm:$0xff]   ;;  %v2563_v62 = vld [vmem:[%s3457_s5 + $0x48] sm:$0xff]  }
 0x180   : > { %v753_v21 = vsel %vm743_vm4, %v728_v35, %v730_v8  ;;  %v802_v15 = vmax.f32 %v2908_v45, %v730_v8  ;;  %2278 = vmatprep.mubr.msk.bf16.mxu0 %vm1107_vm5, %v880_v4  ;;  %2285 = vmatprep.mubr.msk.bf16.mxu1 %vm1107_vm5, %v880_v4  ;;  %v864_v25 = vmax.f32 %v838_v13, 0.0 }
 0x181   : > { %v801_v18 = vmax.f32 %v2905_v43, %v753_v21  ;;  %1192 = vmatmul.mubr.bf16.gmra.mrb[40].mxu0 %v879_v11  ;;  %1287 = vmatmul.mubr.bf16.gmra.mrb[40].mxu1 %v879_v11  ;;  %v863_v24 = vmax.f32 %v837_v40, 0.0 }
 0x182   : > { %v840_v38 = vadd.f32 %v2942_v3, %v802_v15  ;;  %v732_v19 = vpop.permute.xlu0 %731 }
 0x183   : > { %v839_v20 = vadd.f32 %v2950_v17, %v801_v18  ;;  %v734_v23 = vpop.permute.xlu1 %733 }
 0x184   : > { %v866_v26 = vmax.f32 %v840_v38, 0.0  ;;  %v754_v45 = vsel %vm743_vm4, %v732_v19, %v734_v23  ;;  %v804_v28 = vmax.f32 %v2915_v48, %v734_v23 }
 0x185   : > { %v865_v7 = vmax.f32 %v839_v20, 0.0  ;;  %v803_v22 = vmax.f32 %v2913_v46, %v754_v45 }
 0x186   : > { %v882_v31 = vpack.c.bf16 %v866_v26, %v864_v25  ;;  %v736_v43 = vpop.permute.xlu0 %735  ;;  %v842_v34 = vadd.f32 %v2942_v3, %v804_v28 }
 0x187   : > { %v738_v33 = vpop.permute.xlu1 %737  ;;  %v881_v12 = vpack.c.bf16 %v865_v7, %v863_v24  ;;  %v841_v48 = vadd.f32 %v2950_v17, %v803_v22 }
 0x188   : > { %v755_v36 = vsel %vm743_vm4, %v736_v43, %v738_v33  ;;  %v806_v29 = vmax.f32 %v2922_v53, %v738_v33  ;;  %2279 = vmatprep.mubr.msk.bf16.mxu0 %vm1107_vm5, %v882_v31  ;;  %2286 = vmatprep.mubr.msk.bf16.mxu1 %vm1107_vm5, %v882_v31  ;;  %v868_v5 = vmax.f32 %v842_v34, 0.0 }
 0x189   : > { %v805_v39 = vmax.f32 %v2919_v51, %v755_v36  ;;  %1202 = vmatmul.mubr.bf16.gmra.mrb[44].mxu0 %v881_v12  ;;  %1295 = vmatmul.mubr.bf16.gmra.mrb[44].mxu1 %v881_v12  ;;  %v867_v49 = vmax.f32 %v841_v48, 0.0 }
 0x18a   : > { %v844_v46 = vadd.f32 %v2942_v3, %v806_v29  ;;  %v740_v41 = vpop.permute.xlu0 %739 }
 0x18b   : > { %v843_v42 = vadd.f32 %v2950_v17, %v805_v39  ;;  %v742_v44 = vpop.permute.xlu1 %741 }
 0x18c   : > { %v870_v27 = vmax.f32 %v844_v46, 0.0  ;;  %v808_v53 = vmax.f32 %v2929_v56, %v742_v44  ;;  %v756_v47 = vsel %vm743_vm4, %v740_v41, %v742_v44 }
 0x18d   : > { %v869_v50 = vmax.f32 %v843_v42, 0.0  ;;  %v807_v9 = vmax.f32 %v2927_v54, %v756_v47 }
 0x18e   : > { %v884_v52 = vpack.c.bf16 %v870_v27, %v868_v5  ;;  %v846_v51 = vadd.f32 %v2942_v3, %v808_v53  ;;  %v2554_v3 = vld [vmem:[%s3457_s5] sm:$0xff]  }
 0x18f   : > { %v845_v32 = vadd.f32 %v2950_v17, %v807_v9  ;;  %v883_v55 = vpack.c.bf16 %v869_v50, %v867_v49  ;;  %1643 = vmatpush1.bf16.msra.mxu0 %v2554_v3  ;;  %v2555_v17 = vld [vmem:[%s3457_s5 + $0x8] sm:$0xff]   ;;  %2479 = vmatpush1.bf16.msra.mxu1 %v2554_v3 }
 0x190   : > { %v872_v30 = vmax.f32 %v846_v51, 0.0  ;;  %2280 = vmatprep.mubr.msk.bf16.mxu0 %vm1107_vm5, %v884_v52  ;;  %2287 = vmatprep.mubr.msk.bf16.mxu1 %vm1107_vm5, %v884_v52 }
 0x191   : > { %1212 = vmatmul.mubr.bf16.gmra.mrb[48].mxu0 %v883_v55  ;;  %1303 = vmatmul.mubr.bf16.gmra.mrb[48].mxu1 %v883_v55  ;;  %v871_v57 = vmax.f32 %v845_v32, 0.0 }
 0x192   : > { %v886_v56 = vpack.c.bf16 %v872_v30, %v872_v30  ;;  %1644 = vmatprep.subr.bf16.mxu0 %v2584_v10  ;;  %2470 = vmatprep.subr.bf16.mxu1 %v2584_v10 }
 0x193   : > { %v885_v54 = vpack.c.bf16 %v871_v57, %v871_v57  ;;  %1645 = vmatpush1.bf16.msra.mxu0 %v2555_v17  ;;  %2480 = vmatpush1.bf16.msra.mxu1 %v2555_v17 }
 0x194   : > { %2281 = vmatprep.mubr.msk.bf16.mxu0 %vm1107_vm5, %v886_v56  ;;  %2288 = vmatprep.mubr.msk.bf16.mxu1 %vm1107_vm5, %v886_v56 }
 0x195   : > { %1646 = vmatprep.subr.bf16.mxu0 %v2584_v10  ;;  %2471 = vmatprep.subr.bf16.mxu1 %v2584_v10 }
 0x197   : > { %1647 = vmatpush1.bf16.msra.mxu0 %v2556_v58  ;;  %2481 = vmatpush1.bf16.msra.mxu1 %v2556_v58 }
 0x198   : > { %1648 = vmatprep.subr.bf16.mxu0 %v2584_v10  ;;  %2472 = vmatprep.subr.bf16.mxu1 %v2584_v10 }
 0x199   : > { %1222 = vmatmul.mubr.bf16.gmra.mrb[52].mxu0 %v885_v54  ;;  %1311 = vmatmul.mubr.bf16.gmra.mrb[52].mxu1 %v885_v54 }
 0x19b   : > { %1649 = vmatpush1.bf16.msra.mxu0 %v2557_v59  ;;  %2482 = vmatpush1.bf16.msra.mxu1 %v2557_v59 }
 0x19c   : > { %1650 = vmatprep.subr.bf16.mxu0 %v2584_v10  ;;  %2473 = vmatprep.subr.bf16.mxu1 %v2584_v10 }
 0x19f   : > { %1651 = vmatpush1.bf16.msra.mxu0 %v2558_v16  ;;  %2483 = vmatpush1.bf16.msra.mxu1 %v2558_v16 }
 0x1a0   : > { %1652 = vmatprep.subr.bf16.mxu0 %v2584_v10  ;;  %2474 = vmatprep.subr.bf16.mxu1 %v2584_v10 }
 0x1a3   : > { %1653 = vmatpush1.bf16.msra.mxu0 %v2559_v60  ;;  %2484 = vmatpush1.bf16.msra.mxu1 %v2559_v60 }
 0x1a4   : > { %1654 = vmatprep.subr.bf16.mxu0 %v2584_v10  ;;  %2475 = vmatprep.subr.bf16.mxu1 %v2584_v10 }
 0x1a7   : > { %1655 = vmatpush1.bf16.msra.mxu0 %v2560_v37  ;;  %2485 = vmatpush1.bf16.msra.mxu1 %v2560_v37  ;;  %v1462_v37 = vld [vmem:[%s3456_s4] sm:$0x3] }
 0x1a8   : > { %1656 = vmatprep.subr.bf16.mxu0 %v2584_v10  ;;  %2476 = vmatprep.subr.bf16.mxu1 %v2584_v10 }
 0x1ab   : > { %1657 = vmatpush1.bf16.msra.mxu0 %v2561_v61  ;;  %2486 = vmatpush1.bf16.msra.mxu1 %v2561_v61 }
 0x1ac   : > { %1658 = vmatprep.subr.bf16.mxu0 %v2584_v10  ;;  %2477 = vmatprep.subr.bf16.mxu1 %v2584_v10 }
 0x1af   : > { %1659 = vmatpush1.bf16.msra.mxu0 %v2562_v14  ;;  %2487 = vmatpush1.bf16.msra.mxu1 %v2562_v14  ;;  %v3174_v14 = vrot.slane %v1462_v37, %v817_v0 }
 0x1b0   : > { %1660 = vmatprep.subr.bf16.mxu0 %v2584_v10  ;;  %2478 = vmatprep.subr.bf16.mxu1 %v2584_v10 }
 0x1b3   : > { %1661 = vmatpush1.bf16.msra.mxu0 %v2563_v62  ;;  %2488 = vmatpush1.bf16.msra.mxu1 %v2563_v62 }
 0x1b4   : > { %2393 = vmatprep.subr.bf16.mxu1 %v2582_v1  ;;  %2425 = vmatprep.subr.bf16.mxu0 %v2582_v1 }
 0x23c   : > { %v3076_v2 = vpop.f32.mrb[28].mxu0  ;;  %v1264_v4 = vpop.f32.mrb[28].mxu1 }
 0x23d   : > { %1346 = vrot.lane.b32.xlu1 %v1264_v4, %s2587_s25  ;;  %v3081_v35 = vpop.f32.mrb[29].mxu0  ;;  %v1266_v8 = vpop.f32.mrb[29].mxu1 }
 0x23e   : > { %v1267_v10 = vpop.f32.mrb[30].mxu1  ;;  %1344 = vrot.lane.b32.xlu0 %v3081_v35, %s2587_s25  ;;  %v3085_v11 = vpop.f32.mrb[30].mxu0 }
 0x23f   : > { %v3087_v13 = vpop.f32.mrb[31].mxu0  ;;  %v1269_v21 = vpop.f32.mrb[31].mxu1 }
 0x241   : > { %1350 = vrot.lane.b32.xlu1 %v1267_v10, %s2587_s25  ;;  %v3180_v10 = vrot.slane %v1462_v37, %v813_v6 }
 0x242   : > { %1348 = vrot.lane.b32.xlu0 %v3087_v13, %s2587_s25 }
 0x244   : > { %v3092_v15 = vpop.f32.mrb[32].mxu0  ;;  %v1272_v40 = vpop.f32.mrb[32].mxu1 }
 0x245   : > { %1354 = vrot.lane.b32.xlu1 %v1272_v40, %s2587_s25  ;;  %v3095_v18 = vpop.f32.mrb[33].mxu0  ;;  %v1274_v38 = vpop.f32.mrb[33].mxu1 }
 0x246   : > { %v1275_v19 = vpop.f32.mrb[34].mxu1  ;;  %1352 = vrot.lane.b32.xlu0 %v3095_v18, %s2587_s25  ;;  %v3099_v20 = vpop.f32.mrb[34].mxu0 }
 0x247   : > { %v3101_v23 = vpop.f32.mrb[35].mxu0  ;;  %v1277_v25 = vpop.f32.mrb[35].mxu1 }
 0x249   : > { %1358 = vrot.lane.b32.xlu1 %v1275_v19, %s2587_s25 }
 0x24a   : > { %1356 = vrot.lane.b32.xlu0 %v3101_v23, %s2587_s25 }
 0x24c   : > { %v3106_v26 = vpop.f32.mrb[36].mxu0  ;;  %v1280_v45 = vpop.f32.mrb[36].mxu1 }
 0x24d   : > { %1362 = vrot.lane.b32.xlu1 %v1280_v45, %s2587_s25  ;;  %v3109_v28 = vpop.f32.mrb[37].mxu0  ;;  %v1282_v24 = vpop.f32.mrb[37].mxu1 }
 0x24e   : > { %v1283_v7 = vpop.f32.mrb[38].mxu1  ;;  %1360 = vrot.lane.b32.xlu0 %v3109_v28, %s2587_s25  ;;  %v3113_v22 = vpop.f32.mrb[38].mxu0 }
 0x24f   : > { %v3115_v31 = vpop.f32.mrb[39].mxu0  ;;  %v1285_v43 = vpop.f32.mrb[39].mxu1 }
 0x251   : > { %1366 = vrot.lane.b32.xlu1 %v1283_v7, %s2587_s25 }
 0x252   : > { %1364 = vrot.lane.b32.xlu0 %v3115_v31, %s2587_s25 }
 0x254   : > { %v3120_v33 = vpop.f32.mrb[40].mxu0  ;;  %v1288_v12 = vpop.f32.mrb[40].mxu1 }
 0x255   : > { %1370 = vrot.lane.b32.xlu1 %v1288_v12, %s2587_s25  ;;  %v3123_v34 = vpop.f32.mrb[41].mxu0  ;;  %v1290_v36 = vpop.f32.mrb[41].mxu1 }
 0x256   : > { %v1291_v29 = vpop.f32.mrb[42].mxu1  ;;  %1368 = vrot.lane.b32.xlu0 %v3123_v34, %s2587_s25  ;;  %v3127_v48 = vpop.f32.mrb[42].mxu0 }
 0x257   : > { %v3129_v39 = vpop.f32.mrb[43].mxu0  ;;  %v1293_v46 = vpop.f32.mrb[43].mxu1 }
 0x259   : > { %1374 = vrot.lane.b32.xlu1 %v1291_v29, %s2587_s25 }
 0x25a   : > { %1372 = vrot.lane.b32.xlu0 %v3129_v39, %s2587_s25 }
 0x25c   : > { %v3134_v41 = vpop.f32.mrb[44].mxu0  ;;  %v1296_v42 = vpop.f32.mrb[44].mxu1 }
 0x25d   : > { %1378 = vrot.lane.b32.xlu1 %v1296_v42, %s2587_s25  ;;  %v3137_v44 = vpop.f32.mrb[45].mxu0  ;;  %v1298_v5 = vpop.f32.mrb[45].mxu1 }
 0x25e   : > { %v1299_v27 = vpop.f32.mrb[46].mxu1  ;;  %1376 = vrot.lane.b32.xlu0 %v3137_v44, %s2587_s25  ;;  %v3141_v53 = vpop.f32.mrb[46].mxu0 }
 0x25f   : > { %v3143_v47 = vpop.f32.mrb[47].mxu0  ;;  %v1301_v49 = vpop.f32.mrb[47].mxu1 }
 0x261   : > { %1382 = vrot.lane.b32.xlu1 %v1299_v27, %s2587_s25 }
 0x262   : > { %1380 = vrot.lane.b32.xlu0 %v3143_v47, %s2587_s25 }
 0x264   : > { %v3148_v50 = vpop.f32.mrb[48].mxu0  ;;  %v1304_v9 = vpop.f32.mrb[48].mxu1 }
 0x265   : > { %1386 = vrot.lane.b32.xlu1 %v1304_v9, %s2587_s25  ;;  %v3151_v52 = vpop.f32.mrb[49].mxu0  ;;  %v1306_v51 = vpop.f32.mrb[49].mxu1 }
 0x266   : > { %v1307_v32 = vpop.f32.mrb[50].mxu1  ;;  %1384 = vrot.lane.b32.xlu0 %v3151_v52, %s2587_s25  ;;  %v3155_v55 = vpop.f32.mrb[50].mxu0 }
 0x267   : > { %v3157_v30 = vpop.f32.mrb[51].mxu0  ;;  %v1309_v56 = vpop.f32.mrb[51].mxu1 }
 0x269   : > { %1390 = vrot.lane.b32.xlu1 %v1307_v32, %s2587_s25 }
 0x26a   : > { %1388 = vrot.lane.b32.xlu0 %v3157_v30, %s2587_s25 }
 0x26c   : > { %v3162_v57 = vpop.f32.mrb[52].mxu0  ;;  %v1312_v54 = vpop.f32.mrb[52].mxu1 }
 0x26d   : > { %1394 = vrot.lane.b32.xlu1 %v1312_v54, %s2587_s25  ;;  %v3165_v3 = vpop.f32.mrb[53].mxu0  ;;  %v1314_v17 = vpop.f32.mrb[53].mxu1 }
 0x26e   : > { %v1315_v58 = vpop.f32.mrb[54].mxu1  ;;  %1392 = vrot.lane.b32.xlu0 %v3165_v3, %s2587_s25  ;;  %v1227_v59 = vpop.f32.mrb[54].mxu0 }
 0x26f   : > { %v1228_v16 = vpop.f32.mrb[55].mxu0  ;;  %v1316_v60 = vpop.f32.mrb[55].mxu1 }
 0x2af   : > { %v1347_v61 = vpop.permute.xlu1 %1346 }
 0x2b0   : > { %v1437_v62 = vmax.f32 %v3081_v35, %v1347_v61  ;;  %v1345_v4 = vpop.permute.xlu0 %1344 }
 0x2b1   : > { %v1397_v8 = vsel %vm1396_vm6, %v1345_v4, %v1347_v61 }
 0x2b2   : > { %v1436_v21 = vmax.f32 %v3076_v2, %v1397_v8  ;;  %v1475_v38 = vadd.f32 %v3174_v14, %v1437_v62 }
 0x2b3   : > { %v1351_v40 = vpop.permute.xlu1 %1350 }
 0x2b4   : > { %v1439_v19 = vmax.f32 %v3087_v13, %v1351_v40  ;;  %v1349_v25 = vpop.permute.xlu0 %1348  ;;  %v1474_v45 = vadd.f32 %v3180_v10, %v1436_v21  ;;  %v1501_v63 = vmax.f32 %v1475_v38, 0.0 }
 0x2b5   : > { %v1398_v0 = vsel %vm1396_vm6, %v1349_v25, %v1351_v40 }
 0x2b6   : > { %v1477_v35 = vadd.f32 %v3174_v14, %v1439_v19  ;;  %v1438_v24 = vmax.f32 %v3085_v11, %v1398_v0  ;;  %v1500_v13 = vmax.f32 %v1474_v45, 0.0 }
 0x2b7   : > { %v1355_v7 = vpop.permute.xlu1 %1354 }
 0x2b8   : > { %v1503_v6 = vmax.f32 %v1477_v35, 0.0  ;;  %v1476_v43 = vadd.f32 %v3180_v10, %v1438_v24  ;;  %v1441_v2 = vmax.f32 %v3095_v18, %v1355_v7  ;;  %v1353_v12 = vpop.permute.xlu0 %1352 }
 0x2b9   : > { %v1399_v36 = vsel %vm1396_vm6, %v1353_v12, %v1355_v7 }
 0x2ba   : > { %v1527_v29 = vpack.c.bf16 %v1503_v6, %v1501_v63  ;;  %v1502_v46 = vmax.f32 %v1476_v43, 0.0  ;;  %v1440_v42 = vmax.f32 %v3092_v15, %v1399_v36  ;;  %v1479_v11 = vadd.f32 %v3174_v14, %v1441_v2 }
 0x2bb   : > { %v1359_v5 = vpop.permute.xlu1 %1358 }
 0x2bc   : > { %v1526_v27 = vpack.c.bf16 %v1502_v46, %v1500_v13  ;;  %v1443_v49 = vmax.f32 %v3101_v23, %v1359_v5  ;;  %2299 = vmatprep.mubr.msk.bf16.mxu0 %vm1620_vm7, %v1527_v29  ;;  %v1357_v9 = vpop.permute.xlu0 %1356  ;;  %v1478_v51 = vadd.f32 %v3180_v10, %v1440_v42  ;;  %v1505_v15 = vmax.f32 %v1479_v11, 0.0 }
 0x2bd   : > { %v1400_v18 = vsel %vm1396_vm6, %v1357_v9, %v1359_v5 }
 0x2be   : > { %v1481_v32 = vadd.f32 %v3174_v14, %v1443_v49  ;;  %v1442_v56 = vmax.f32 %v3099_v20, %v1400_v18  ;;  %1675 = vmatmul.mubr.bf16.vlgmr.msra.gmra.mrb[56].mxu0 %v1526_v27  ;;  %v1504_v60 = vmax.f32 %v1478_v51, 0.0 }
 0x2bf   : > { %v1363_v54 = vpop.permute.xlu1 %1362 }
 0x2c0   : > { %v1507_v17 = vmax.f32 %v1481_v32, 0.0  ;;  %v1480_v58 = vadd.f32 %v3180_v10, %v1442_v56  ;;  %v1445_v59 = vmax.f32 %v3109_v28, %v1363_v54  ;;  %v1361_v23 = vpop.permute.xlu0 %1360 }
 0x2c1   : > { %v1401_v16 = vsel %vm1396_vm6, %v1361_v23, %v1363_v54 }
 0x2c2   : > { %v1529_v37 = vpack.c.bf16 %v1507_v17, %v1505_v15  ;;  %v1506_v61 = vmax.f32 %v1480_v58, 0.0  ;;  %v1444_v62 = vmax.f32 %v3106_v26, %v1401_v16  ;;  %v1483_v8 = vadd.f32 %v3174_v14, %v1445_v59 }
 0x2c3   : > { %v1367_v4 = vpop.permute.xlu1 %1366 }
 0x2c4   : > { %v1447_v20 = vmax.f32 %v3115_v31, %v1367_v4  ;;  %2300 = vmatprep.mubr.msk.bf16.mxu0 %vm1620_vm7, %v1529_v37  ;;  %v1365_v21 = vpop.permute.xlu0 %1364  ;;  %v1528_v40 = vpack.c.bf16 %v1506_v61, %v1504_v60  ;;  %v1482_v28 = vadd.f32 %v3180_v10, %v1444_v62  ;;  %v1509_v26 = vmax.f32 %v1483_v8, 0.0 }
 0x2c5   : > { %v1402_v38 = vsel %vm1396_vm6, %v1365_v21, %v1367_v4 }
 0x2c6   : > { %v1485_v19 = vadd.f32 %v3174_v14, %v1447_v20  ;;  %v1446_v25 = vmax.f32 %v3113_v22, %v1402_v38  ;;  %1683 = vmatmul.mubr.bf16.gmra.mrb[60].mxu0 %v1528_v40  ;;  %v1508_v63 = vmax.f32 %v1482_v28, 0.0 }
 0x2c7   : > { %v1371_v0 = vpop.permute.xlu1 %1370 }
 0x2c8   : > { %v1511_v45 = vmax.f32 %v1485_v19, 0.0  ;;  %v1484_v35 = vadd.f32 %v3180_v10, %v1446_v25  ;;  %v1449_v31 = vmax.f32 %v3123_v34, %v1371_v0  ;;  %v1369_v24 = vpop.permute.xlu0 %1368 }
 0x2c9   : > { %v1403_v7 = vsel %vm1396_vm6, %v1369_v24, %v1371_v0 }
 0x2ca   : > { %v1531_v6 = vpack.c.bf16 %v1511_v45, %v1509_v26  ;;  %v1510_v43 = vmax.f32 %v1484_v35, 0.0  ;;  %v1448_v2 = vmax.f32 %v3120_v33, %v1403_v7  ;;  %v1487_v36 = vadd.f32 %v3174_v14, %v1449_v31 }
 0x2cb   : > { %v1375_v12 = vpop.permute.xlu1 %1374 }
 0x2cc   : > { %v1451_v22 = vmax.f32 %v3129_v39, %v1375_v12  ;;  %2301 = vmatprep.mubr.msk.bf16.mxu0 %vm1620_vm7, %v1531_v6  ;;  %v1373_v13 = vpop.permute.xlu0 %1372  ;;  %v1530_v29 = vpack.c.bf16 %v1510_v43, %v1508_v63  ;;  %v1486_v34 = vadd.f32 %v3180_v10, %v1448_v2  ;;  %v1513_v33 = vmax.f32 %v1487_v36, 0.0 }
 0x2cd   : > { %v1404_v46 = vsel %vm1396_vm6, %v1373_v13, %v1375_v12 }
 0x2ce   : > { %v1489_v42 = vadd.f32 %v3174_v14, %v1451_v22  ;;  %v1450_v5 = vmax.f32 %v3127_v48, %v1404_v46  ;;  %1691 = vmatmul.mubr.bf16.gmra.mrb[64].mxu0 %v1530_v29  ;;  %v1512_v51 = vmax.f32 %v1486_v34, 0.0 }
 0x2cf   : > { %v1379_v27 = vpop.permute.xlu1 %1378 }
 0x2d0   : > { %v1515_v11 = vmax.f32 %v1489_v42, 0.0  ;;  %v1488_v49 = vadd.f32 %v3180_v10, %v1450_v5  ;;  %v1453_v39 = vmax.f32 %v3137_v44, %v1379_v27  ;;  %v1377_v9 = vpop.permute.xlu0 %1376 }
 0x2d1   : > { %v1405_v18 = vsel %vm1396_vm6, %v1377_v9, %v1379_v27 }
 0x2d2   : > { %v1533_v32 = vpack.c.bf16 %v1515_v11, %v1513_v33  ;;  %v1514_v56 = vmax.f32 %v1488_v49, 0.0  ;;  %v1452_v54 = vmax.f32 %v3134_v41, %v1405_v18  ;;  %v1491_v17 = vadd.f32 %v3174_v14, %v1453_v39 }
 0x2d3   : > { %v1383_v15 = vpop.permute.xlu1 %1382 }
 0x2d4   : > { %v1455_v48 = vmax.f32 %v3143_v47, %v1383_v15  ;;  %2302 = vmatprep.mubr.msk.bf16.mxu0 %vm1620_vm7, %v1533_v32  ;;  %v1381_v58 = vpop.permute.xlu0 %1380  ;;  %v1532_v59 = vpack.c.bf16 %v1514_v56, %v1512_v51  ;;  %v1490_v44 = vadd.f32 %v3180_v10, %v1452_v54  ;;  %v1517_v41 = vmax.f32 %v1491_v17, 0.0 }
 0x2d5   : > { %v1406_v23 = vsel %vm1396_vm6, %v1381_v58, %v1383_v15 }
 0x2d6   : > { %v1493_v16 = vadd.f32 %v3174_v14, %v1455_v48  ;;  %v1454_v60 = vmax.f32 %v3141_v53, %v1406_v23  ;;  %1699 = vmatmul.mubr.bf16.gmra.mrb[68].mxu0 %v1532_v59  ;;  %v1516_v20 = vmax.f32 %v1490_v44, 0.0 }
 0x2d7   : > { %v1387_v37 = vpop.permute.xlu1 %1386  ;;  %2441 = vmatprep.mubr.msk.bf16.mxu0 %vm2585_vm2, %v2582_v1 }
 0x2d8   : > { %v1519_v61 = vmax.f32 %v1493_v16, 0.0  ;;  %v1492_v47 = vadd.f32 %v3180_v10, %v1454_v60  ;;  %v1457_v62 = vmax.f32 %v3151_v52, %v1387_v37  ;;  %v1385_v4 = vpop.permute.xlu0 %1384 }
 0x2d9   : > { %v1407_v8 = vsel %vm1396_vm6, %v1385_v4, %v1387_v37 }
 0x2da   : > { %v1535_v21 = vpack.c.bf16 %v1519_v61, %v1517_v41  ;;  %v1518_v40 = vmax.f32 %v1492_v47, 0.0  ;;  %v1456_v38 = vmax.f32 %v3148_v50, %v1407_v8  ;;  %v1495_v19 = vadd.f32 %v3174_v14, %v1457_v62  ;;  %v2566_v41 = vld [vmem:[%s3461_s9] sm:$0xff]   ;;  %v2567_v47 = vld [vmem:[%s3461_s9 + $0x8] sm:$0xff]  }
 0x2db   : > { %v1391_v53 = vpop.permute.xlu1 %1390  ;;  %2426 = vmatpush3.bf16.msra.mxu0 %v2566_v41 }
 0x2dc   : > { %v1534_v28 = vpack.c.bf16 %v1518_v40, %v1516_v20  ;;  %v1459_v25 = vmax.f32 %v3157_v30, %v1391_v53  ;;  %2303 = vmatprep.mubr.msk.bf16.mxu1 %vm1620_vm7, %v1535_v21  ;;  %v1389_v0 = vpop.permute.xlu0 %1388  ;;  %v1494_v26 = vadd.f32 %v3180_v10, %v1456_v38  ;;  %v1521_v50 = vmax.f32 %v1495_v19, 0.0  ;;  %2427 = vmatprep.subr.bf16.mxu0 %v2582_v1  ;;  %v2568_v20 = vld [vmem:[%s3461_s9 + $0x10] sm:$0xff]   ;;  %v2569_v21 = vld [vmem:[%s3461_s9 + $0x18] sm:$0xff]   ;;  %v2570_v40 = vld [vmem:[%s3461_s9 + $0x20] sm:$0xff]  }
 0x2dd   : > { %v1408_v52 = vsel %vm1396_vm6, %v1389_v0, %v1391_v53  ;;  %v2571_v38 = vld [vmem:[%s3461_s9 + $0x28] sm:$0xff]   ;;  %v3342_v53 = vld [vmem:[%s3458_s6] ss:$0 sm:$0xff] }
 0x2de   : > { %v1497_v45 = vadd.f32 %v3174_v14, %v1459_v25  ;;  %v1458_v35 = vmax.f32 %v3155_v55, %v1408_v52  ;;  %1707 = vmatmul.mubr.bf16.vlgmr.msra.gmra.mrb[56].mxu1 %v1534_v28  ;;  %v1520_v6 = vmax.f32 %v1494_v26, 0.0 }
 0x2df   : > { %v1395_v31 = vpop.permute.xlu1 %1394  ;;  %2428 = vmatpush3.bf16.msra.mxu0 %v2567_v47 }
 0x2e0   : > { %v1523_v24 = vmax.f32 %v1497_v45, 0.0  ;;  %v1496_v7 = vadd.f32 %v3180_v10, %v1458_v35  ;;  %v1461_v63 = vmax.f32 %v3165_v3, %v1395_v31  ;;  %v1393_v30 = vpop.permute.xlu0 %1392  ;;  %2429 = vmatprep.subr.bf16.mxu0 %v2582_v1 }
 0x2e1   : > { %v1409_v43 = vsel %vm1396_vm6, %v1393_v30, %v1395_v31 }
 0x2e2   : > { %v1537_v2 = vpack.c.bf16 %v1523_v24, %v1521_v50  ;;  %v1522_v12 = vmax.f32 %v1496_v7, 0.0  ;;  %v1499_v36 = vadd.f32 %v3174_v14, %v1461_v63  ;;  %v1460_v22 = vmax.f32 %v3162_v57, %v1409_v43  ;;  %v2564_v57 = vld [vmem:[%s3459_s7] sm:$0xff]   ;;  %v2565_v14 = vld [vmem:[%s3459_s7 + $0x8] sm:$0xff]  }
 0x2e3   : > { %2394 = vmatpush3.bf16.msra.mxu1 %v2564_v57  ;;  %2430 = vmatpush3.bf16.msra.mxu0 %v2568_v20 }
 0x2e4   : > { %v1525_v13 = vmax.f32 %v1499_v36, 0.0  ;;  %v1498_v55 = vadd.f32 %v3180_v10, %v1460_v22  ;;  %2304 = vmatprep.mubr.msk.bf16.mxu1 %vm1620_vm7, %v1537_v2  ;;  %v1536_v29 = vpack.c.bf16 %v1522_v12, %v1520_v6  ;;  %2395 = vmatprep.subr.bf16.mxu1 %v2582_v1 }
 0x2e5   : > { %2431 = vmatprep.subr.bf16.mxu0 %v2582_v1 }
 0x2e6   : > { %v1539_v46 = vpack.c.bf16 %v1525_v13, %v1525_v13  ;;  %1715 = vmatmul.mubr.bf16.gmra.mrb[60].mxu1 %v1536_v29  ;;  %v1524_v3 = vmax.f32 %v1498_v55, 0.0 }
 0x2e7   : > { %2396 = vmatpush3.bf16.msra.mxu1 %v2565_v14  ;;  %2432 = vmatpush3.bf16.msra.mxu0 %v2569_v21 }
 0x2e8   : > { %2305 = vmatprep.mubr.msk.bf16.mxu1 %vm1620_vm7, %v1539_v46  ;;  %v1538_v34 = vpack.c.bf16 %v1524_v3, %v1524_v3  ;;  %2433 = vmatprep.subr.bf16.mxu0 %v2582_v1 }
 0x2eb   : > { %2434 = vmatpush3.bf16.msra.mxu0 %v2570_v40  ;;  %v2572_v40 = vld [vmem:[%s3461_s9 + $0x30] sm:$0xff]  }
 0x2ec   : > { %2435 = vmatprep.subr.bf16.mxu0 %v2582_v1 }
 0x2ee   : > { %1723 = vmatmul.mubr.bf16.gmra.mrb[64].mxu1 %v1538_v34 }
 0x2ef   : > { %2397 = vmatprep.mubr.msk.bf16.mxu1 %vm2585_vm2, %v2582_v1  ;;  %2436 = vmatpush3.bf16.msra.mxu0 %v2571_v38  ;;  %v3399_v38 = vld [vmem:[%s3460_s8] ss:$0 sm:$0xff] }
 0x2f0   : > { %2437 = vmatprep.subr.bf16.mxu0 %v2582_v1 }
 0x2f3   : > { %2438 = vmatpush3.bf16.msra.mxu0 %v2572_v40 }
 0x2f4   : > { %2439 = vmatprep.subr.bf16.mxu0 %v2582_v1 }
 0x391   : > { %v3263_v10 = vpop.f32.mrb[56].mxu0 }
 0x392   : > { %1743 = vrot.lane.b32.xlu0 %v3263_v10, %s2587_s25  ;;  %v1678_v42 = vpop.f32.mrb[57].mxu0 }
 0x393   : > { %v3267_v5 = vpop.f32.mrb[58].mxu0 }
 0x394   : > { %1745 = vrot.lane.b32.xlu1 %v3267_v5, %s2587_s25  ;;  %v1681_v27 = vpop.f32.mrb[59].mxu0 }
 0x399   : > { %v3271_v33 = vpop.f32.mrb[60].mxu0 }
 0x39a   : > { %1747 = vrot.lane.b32.xlu0 %v3271_v33, %s2587_s25  ;;  %v1686_v11 = vpop.f32.mrb[61].mxu0 }
 0x39b   : > { %v3275_v49 = vpop.f32.mrb[62].mxu0 }
 0x39c   : > { %1749 = vrot.lane.b32.xlu1 %v3275_v49, %s2587_s25  ;;  %v1689_v39 = vpop.f32.mrb[63].mxu0 }
 0x3a1   : > { %v3279_v9 = vpop.f32.mrb[64].mxu0 }
 0x3a2   : > { %1751 = vrot.lane.b32.xlu0 %v3279_v9, %s2587_s25  ;;  %v1694_v18 = vpop.f32.mrb[65].mxu0 }
 0x3a3   : > { %v3283_v51 = vpop.f32.mrb[66].mxu0 }
 0x3a4   : > { %1753 = vrot.lane.b32.xlu1 %v3283_v51, %s2587_s25  ;;  %v1697_v32 = vpop.f32.mrb[67].mxu0 }
 0x3a9   : > { %v3287_v56 = vpop.f32.mrb[68].mxu0 }
 0x3aa   : > { %1755 = vrot.lane.b32.xlu0 %v3287_v56, %s2587_s25  ;;  %v1702_v54 = vpop.f32.mrb[69].mxu0 }
 0x3ab   : > { %v3291_v15 = vpop.f32.mrb[70].mxu0 }
 0x3ac   : > { %1757 = vrot.lane.b32.xlu1 %v3291_v15, %s2587_s25  ;;  %v1705_v17 = vpop.f32.mrb[71].mxu0 }
 0x3b1   : > { %v3295_v48 = vpop.f32.mrb[56].mxu1 }
 0x3b2   : > { %v1710_v58 = vpop.f32.mrb[57].mxu1  ;;  %1759 = vrot.lane.b32.xlu0 %v3295_v48, %s2587_s25 }
 0x3b3   : > { %v3299_v59 = vpop.f32.mrb[58].mxu1 }
 0x3b4   : > { %v1713_v23 = vpop.f32.mrb[59].mxu1  ;;  %1761 = vrot.lane.b32.xlu1 %v3299_v59, %s2587_s25 }
 0x3b9   : > { %v3303_v44 = vpop.f32.mrb[60].mxu1 }
 0x3ba   : > { %v1718_v16 = vpop.f32.mrb[61].mxu1  ;;  %1763 = vrot.lane.b32.xlu0 %v3303_v44, %s2587_s25 }
 0x3bb   : > { %v3307_v60 = vpop.f32.mrb[62].mxu1 }
 0x3bc   : > { %v1721_v37 = vpop.f32.mrb[63].mxu1  ;;  %1765 = vrot.lane.b32.xlu1 %v3307_v60, %s2587_s25 }
 0x3c1   : > { %v3314_v61 = vpop.f32.mrb[64].mxu1 }
 0x3c2   : > { %v1726_v62 = vpop.f32.mrb[65].mxu1  ;;  %1767 = vrot.lane.b32.xlu0 %v3314_v61, %s2587_s25 }
 0x3c3   : > { %v1727_v4 = vpop.f32.mrb[66].mxu1 }
 0x3c4   : > { %v1728_v8 = vpop.f32.mrb[67].mxu1 }
 0x404   : > { %v1744_v28 = vpop.permute.xlu0 %1743 }
 0x405   : > { %v1782_v19 = vmax.f32 %v3263_v10, %v1744_v28 }
 0x406   : > { %v1746_v25 = vpop.permute.xlu1 %1745 }
 0x407   : > { %v1802_v0 = vadd.f32 %v3342_v53, %v1782_v19  ;;  %v1783_v26 = vmax.f32 %v3267_v5, %v1746_v25 }
 0x409   : > { %v1803_v52 = vadd.f32 %v3342_v53, %v1783_v26  ;;  %v1815_v45 = vmax.f32 %v1802_v0, 0.0 }
 0x40b   : > { %v1816_v35 = vmax.f32 %v1803_v52, 0.0 }
 0x40c   : > { %v1748_v31 = vpop.permute.xlu0 %1747 }
 0x40d   : > { %v1828_v50 = vpack.c.bf16 %v1816_v35, %v1815_v45  ;;  %v1784_v24 = vmax.f32 %v3271_v33, %v1748_v31 }
 0x40e   : > { %v1750_v7 = vpop.permute.xlu1 %1749 }
 0x40f   : > { %v1804_v63 = vadd.f32 %v3342_v53, %v1784_v24  ;;  %v1785_v30 = vmax.f32 %v3275_v49, %v1750_v7  ;;  %2398 = vmatmul.mubr.msk.bf16.vlgmr.msra.gmra.mrb[68].mxu1 %vm1620_vm7, %v1828_v50 }
 0x410   : > { %2401 = vmatprep.mubr.msk.bf16.mxu1 %vm2585_vm2, %v2582_v1 }
 0x411   : > { %v1805_v6 = vadd.f32 %v3342_v53, %v1785_v30  ;;  %v1817_v43 = vmax.f32 %v1804_v63, 0.0 }
 0x413   : > { %v1818_v2 = vmax.f32 %v1805_v6, 0.0 }
 0x414   : > { %v1752_v12 = vpop.permute.xlu0 %1751 }
 0x415   : > { %v1829_v36 = vpack.c.bf16 %v1818_v2, %v1817_v43  ;;  %v1786_v22 = vmax.f32 %v3279_v9, %v1752_v12 }
 0x416   : > { %v1754_v13 = vpop.permute.xlu1 %1753 }
 0x417   : > { %v1806_v55 = vadd.f32 %v3342_v53, %v1786_v22  ;;  %v1787_v29 = vmax.f32 %v3283_v51, %v1754_v13  ;;  %2402 = vmatmul.mubr.msk.bf16.gmra.mrb[72].mxu1 %vm1620_vm7, %v1829_v36 }
 0x418   : > { %2405 = vmatprep.mubr.msk.bf16.mxu1 %vm2585_vm2, %v2582_v1 }
 0x419   : > { %v1807_v46 = vadd.f32 %v3342_v53, %v1787_v29  ;;  %v1819_v3 = vmax.f32 %v1806_v55, 0.0 }
 0x41b   : > { %v1820_v34 = vmax.f32 %v1807_v46, 0.0 }
 0x41c   : > { %v1756_v57 = vpop.permute.xlu0 %1755 }
 0x41d   : > { %v1830_v14 = vpack.c.bf16 %v1820_v34, %v1819_v3  ;;  %v1788_v10 = vmax.f32 %v3287_v56, %v1756_v57 }
 0x41e   : > { %v1758_v42 = vpop.permute.xlu1 %1757 }
 0x41f   : > { %v1808_v5 = vadd.f32 %v3342_v53, %v1788_v10  ;;  %v1789_v27 = vmax.f32 %v3291_v15, %v1758_v42  ;;  %2406 = vmatmul.mubr.msk.bf16.gmra.mrb[76].mxu1 %vm1620_vm7, %v1830_v14 }
 0x420   : > { %2409 = vmatprep.mubr.msk.bf16.mxu1 %vm2585_vm2, %v2582_v1 }
 0x421   : > { %v1809_v33 = vadd.f32 %v3342_v53, %v1789_v27  ;;  %v1821_v11 = vmax.f32 %v1808_v5, 0.0 }
 0x423   : > { %v1822_v49 = vmax.f32 %v1809_v33, 0.0 }
 0x424   : > { %v1760_v39 = vpop.permute.xlu0 %1759 }
 0x425   : > { %v1831_v9 = vpack.c.bf16 %v1822_v49, %v1821_v11  ;;  %v1790_v18 = vmax.f32 %v3295_v48, %v1760_v39 }
 0x426   : > { %v1762_v51 = vpop.permute.xlu1 %1761 }
 0x427   : > { %v1810_v32 = vadd.f32 %v3342_v53, %v1790_v18  ;;  %v1791_v56 = vmax.f32 %v3299_v59, %v1762_v51  ;;  %2410 = vmatmul.mubr.msk.bf16.gmra.mrb[80].mxu1 %vm1620_vm7, %v1831_v9 }
 0x428   : > { %2413 = vmatprep.mubr.msk.bf16.mxu1 %vm2585_vm2, %v2582_v1 }
 0x429   : > { %v1811_v54 = vadd.f32 %v3342_v53, %v1791_v56  ;;  %v1823_v15 = vmax.f32 %v1810_v32, 0.0 }
 0x42b   : > { %v1824_v17 = vmax.f32 %v1811_v54, 0.0 }
 0x42c   : > { %v1764_v58 = vpop.permute.xlu0 %1763 }
 0x42d   : > { %v1832_v23 = vpack.c.bf16 %v1824_v17, %v1823_v15  ;;  %v1792_v16 = vmax.f32 %v3303_v44, %v1764_v58 }
 0x42e   : > { %v1766_v37 = vpop.permute.xlu1 %1765 }
 0x42f   : > { %v1812_v48 = vadd.f32 %v3342_v53, %v1792_v16  ;;  %v1793_v41 = vmax.f32 %v3307_v60, %v1766_v37  ;;  %2414 = vmatmul.mubr.msk.bf16.gmra.mrb[84].mxu1 %vm1620_vm7, %v1832_v23 }
 0x430   : > { %2417 = vmatprep.mubr.msk.bf16.mxu1 %vm2585_vm2, %v2582_v1 }
 0x431   : > { %v1813_v59 = vadd.f32 %v3342_v53, %v1793_v41  ;;  %v1825_v47 = vmax.f32 %v1812_v48, 0.0 }
 0x433   : > { %v1826_v62 = vmax.f32 %v1813_v59, 0.0 }
 0x434   : > { %v1768_v4 = vpop.permute.xlu0 %1767 }
 0x435   : > { %v1833_v8 = vpack.c.bf16 %v1826_v62, %v1825_v47  ;;  %v1794_v20 = vmax.f32 %v3314_v61, %v1768_v4  ;;  %v2573_v61 = vld [vmem:[%s3461_s9 + $0x38] sm:$0xff]  }
 0x436   : > { %2440 = vmatpush3.bf16.msra.mxu0 %v2573_v61  ;;  %v2317_v61 = vld [vmem:[%s3462_s10] ss:$0 sm:$0xff] }
 0x437   : > { %v1814_v44 = vadd.f32 %v3342_v53, %v1794_v20  ;;  %2418 = vmatmul.mubr.msk.bf16.gmra.mrb[88].mxu1 %vm1620_vm7, %v1833_v8 }
 0x438   : > { %2421 = vmatprep.mubr.msk.bf16.mxu1 %vm2585_vm2, %v2582_v1 }
 0x439   : > { %v1827_v60 = vmax.f32 %v1814_v44, 0.0 }
 0x43b   : > { %v1834_v21 = vpack.c.bf16 %v1827_v60, %v1827_v60 }
 0x43f   : > { %2422 = vmatmul.mubr.msk.bf16.gmra.mrb[92].mxu1 %vm1620_vm7, %v1834_v21 }
 0x4e2   : > { %v1913_v53 = vpop.f32.mrb[68].mxu1 }
 0x4e3   : > { %v1914_v28 = vadd.f32 %v3399_v38, %v1913_v53  ;;  %v2399_v19 = vpop.f32.mrb[69].mxu1 }
 0x4e4   : > { %v1916_v25 = vpop.f32.mrb[70].mxu1 }
 0x4e5   : > { %v1917_v0 = vadd.f32 %v3399_v38, %v1916_v25  ;;  %v2400_v26 = vpop.f32.mrb[71].mxu1  ;;  %v1967_v52 = vmax.f32 %v1914_v28, 0.0 }
 0x4e7   : > { %v1968_v45 = vmax.f32 %v1917_v0, 0.0 }
 0x4e9   : > { %v1980_v35 = vpack.c.bf16 %v1968_v45, %v1967_v52 }
 0x4ea   : > { %v1921_v31 = vpop.f32.mrb[72].mxu1 }
 0x4eb   : > { %v1922_v50 = vadd.f32 %v3399_v38, %v1921_v31  ;;  %v2403_v24 = vpop.f32.mrb[73].mxu1  ;;  %2442 = vmatmul.mubr.bf16.vlgmr.msra.gmra.mrb[72].mxu0 %v1980_v35 }
 0x4ec   : > { %v1924_v7 = vpop.f32.mrb[74].mxu1  ;;  %2445 = vmatprep.mubr.msk.bf16.mxu0 %vm2585_vm2, %v2582_v1 }
 0x4ed   : > { %v1925_v63 = vadd.f32 %v3399_v38, %v1924_v7  ;;  %v2404_v30 = vpop.f32.mrb[75].mxu1  ;;  %v1969_v6 = vmax.f32 %v1922_v50, 0.0 }
 0x4ef   : > { %v1970_v43 = vmax.f32 %v1925_v63, 0.0 }
 0x4f1   : > { %v1981_v2 = vpack.c.bf16 %v1970_v43, %v1969_v6 }
 0x4f2   : > { %v1929_v12 = vpop.f32.mrb[76].mxu1 }
 0x4f3   : > { %v1930_v36 = vadd.f32 %v3399_v38, %v1929_v12  ;;  %v2407_v22 = vpop.f32.mrb[77].mxu1  ;;  %2446 = vmatmul.mubr.bf16.gmra.mrb[76].mxu0 %v1981_v2 }
 0x4f4   : > { %v1932_v13 = vpop.f32.mrb[78].mxu1  ;;  %2449 = vmatprep.mubr.msk.bf16.mxu0 %vm2585_vm2, %v2582_v1 }
 0x4f5   : > { %v1933_v55 = vadd.f32 %v3399_v38, %v1932_v13  ;;  %v2408_v29 = vpop.f32.mrb[79].mxu1  ;;  %v1971_v46 = vmax.f32 %v1930_v36, 0.0 }
 0x4f7   : > { %v1972_v3 = vmax.f32 %v1933_v55, 0.0 }
 0x4f9   : > { %v1982_v34 = vpack.c.bf16 %v1972_v3, %v1971_v46 }
 0x4fa   : > { %v1937_v57 = vpop.f32.mrb[80].mxu1 }
 0x4fb   : > { %v1938_v14 = vadd.f32 %v3399_v38, %v1937_v57  ;;  %v2411_v10 = vpop.f32.mrb[81].mxu1  ;;  %2450 = vmatmul.mubr.bf16.gmra.mrb[80].mxu0 %v1982_v34 }
 0x4fc   : > { %v1940_v42 = vpop.f32.mrb[82].mxu1  ;;  %2453 = vmatprep.mubr.msk.bf16.mxu0 %vm2585_vm2, %v2582_v1 }
 0x4fd   : > { %v1941_v5 = vadd.f32 %v3399_v38, %v1940_v42  ;;  %v2412_v27 = vpop.f32.mrb[83].mxu1  ;;  %v1973_v33 = vmax.f32 %v1938_v14, 0.0 }
 0x4ff   : > { %v1974_v11 = vmax.f32 %v1941_v5, 0.0 }
 0x501   : > { %v1983_v49 = vpack.c.bf16 %v1974_v11, %v1973_v33 }
 0x502   : > { %v1945_v39 = vpop.f32.mrb[84].mxu1 }
 0x503   : > { %v1946_v9 = vadd.f32 %v3399_v38, %v1945_v39  ;;  %v2415_v18 = vpop.f32.mrb[85].mxu1  ;;  %2454 = vmatmul.mubr.bf16.gmra.mrb[84].mxu0 %v1983_v49 }
 0x504   : > { %v1948_v51 = vpop.f32.mrb[86].mxu1  ;;  %2457 = vmatprep.mubr.msk.bf16.mxu0 %vm2585_vm2, %v2582_v1 }
 0x505   : > { %v1949_v32 = vadd.f32 %v3399_v38, %v1948_v51  ;;  %v2416_v56 = vpop.f32.mrb[87].mxu1  ;;  %v1975_v54 = vmax.f32 %v1946_v9, 0.0 }
 0x507   : > { %v1976_v15 = vmax.f32 %v1949_v32, 0.0 }
 0x509   : > { %v1984_v17 = vpack.c.bf16 %v1976_v15, %v1975_v54 }
 0x50a   : > { %v1953_v58 = vpop.f32.mrb[88].mxu1 }
 0x50b   : > { %v1954_v23 = vadd.f32 %v3399_v38, %v1953_v58  ;;  %v2419_v16 = vpop.f32.mrb[89].mxu1  ;;  %2458 = vmatmul.mubr.bf16.gmra.mrb[88].mxu0 %v1984_v17 }
 0x50c   : > { %v1956_v37 = vpop.f32.mrb[90].mxu1  ;;  %2461 = vmatprep.mubr.msk.bf16.mxu0 %vm2585_vm2, %v2582_v1 }
 0x50d   : > { %v1957_v48 = vadd.f32 %v3399_v38, %v1956_v37  ;;  %v2420_v41 = vpop.f32.mrb[91].mxu1  ;;  %v1977_v59 = vmax.f32 %v1954_v23, 0.0 }
 0x50f   : > { %v1978_v47 = vmax.f32 %v1957_v48, 0.0 }
 0x511   : > { %v1985_v62 = vpack.c.bf16 %v1978_v47, %v1977_v59 }
 0x512   : > { %v1961_v4 = vpop.f32.mrb[92].mxu1 }
 0x513   : > { %v1962_v8 = vadd.f32 %v3399_v38, %v1961_v4  ;;  %v2423_v20 = vpop.f32.mrb[93].mxu1  ;;  %2462 = vmatmul.mubr.bf16.gmra.mrb[92].mxu0 %v1985_v62 }
 0x514   : > { %v1964_v44 = vpop.f32.mrb[94].mxu1  ;;  %2465 = vmatprep.mubr.msk.bf16.mxu0 %vm2585_vm2, %v2582_v1 }
 0x515   : > { %v1979_v60 = vmax.f32 %v1962_v8, 0.0  ;;  %v2424_v21 = vpop.f32.mrb[95].mxu1 }
 0x517   : > { %v1986_v40 = vpack.c.bf16 %v1979_v60, %v1979_v60 }
 0x51b   : > { %2466 = vmatmul.mubr.bf16.gmra.mrb[96].mxu0 %v1986_v40 }
 0x5be   : > { %v2092_v38 = vpop.f32.mrb[72].mxu0 }
 0x5bf   : > { %v2093_v1 = vadd.f32 %v2317_v61, %v2092_v38  ;;  %v2443_v53 = vpop.f32.mrb[73].mxu0 }
 0x5c0   : > { %v2095_v28 = vpop.f32.mrb[74].mxu0 }
 0x5c1   : > { %2146 = vst [vmem:[%s3434_s24] sm:$0xff] %v2093_v1  ;;  %v2096_v19 = vadd.f32 %v2317_v61, %v2095_v28  ;;  %v2444_v25 = vpop.f32.mrb[75].mxu0 }
 0x5c3   : > { %2147 = vst [vmem:[%s3434_s24 + $0x8] sm:$0xff] %v2096_v19 }
 0x5c6   : > { %v2100_v0 = vpop.f32.mrb[76].mxu0 }
 0x5c7   : > { %v2101_v26 = vadd.f32 %v2317_v61, %v2100_v0  ;;  %v2447_v52 = vpop.f32.mrb[77].mxu0 }
 0x5c8   : > { %v2103_v45 = vpop.f32.mrb[78].mxu0 }
 0x5c9   : > { %2148 = vst [vmem:[%s3434_s24 + $0x10] sm:$0xff] %v2101_v26  ;;  %v2104_v35 = vadd.f32 %v2317_v61, %v2103_v45  ;;  %v2448_v31 = vpop.f32.mrb[79].mxu0 }
 0x5cb   : > { %2149 = vst [vmem:[%s3434_s24 + $0x18] sm:$0xff] %v2104_v35 }
 0x5ce   : > { %v2108_v50 = vpop.f32.mrb[80].mxu0 }
 0x5cf   : > { %v2109_v24 = vadd.f32 %v2317_v61, %v2108_v50  ;;  %v2451_v7 = vpop.f32.mrb[81].mxu0 }
 0x5d0   : > { %v2111_v63 = vpop.f32.mrb[82].mxu0 }
 0x5d1   : > { %2150 = vst [vmem:[%s3434_s24 + $0x20] sm:$0xff] %v2109_v24  ;;  %v2112_v30 = vadd.f32 %v2317_v61, %v2111_v63  ;;  %v2452_v6 = vpop.f32.mrb[83].mxu0 }
 0x5d3   : > { %2151 = vst [vmem:[%s3434_s24 + $0x28] sm:$0xff] %v2112_v30 }
 0x5d6   : > { %v2116_v43 = vpop.f32.mrb[84].mxu0 }
 0x5d7   : > { %v2117_v2 = vadd.f32 %v2317_v61, %v2116_v43  ;;  %v2455_v12 = vpop.f32.mrb[85].mxu0 }
 0x5d8   : > { %v2119_v36 = vpop.f32.mrb[86].mxu0 }
 0x5d9   : > { %2152 = vst [vmem:[%s3434_s24 + $0x30] sm:$0xff] %v2117_v2  ;;  %v2120_v22 = vadd.f32 %v2317_v61, %v2119_v36  ;;  %v2456_v13 = vpop.f32.mrb[87].mxu0 }
 0x5db   : > { %2153 = vst [vmem:[%s3434_s24 + $0x38] sm:$0xff] %v2120_v22 }
 0x5de   : > { %v2124_v55 = vpop.f32.mrb[88].mxu0 }
 0x5df   : > { %v2125_v29 = vadd.f32 %v2317_v61, %v2124_v55  ;;  %v2459_v46 = vpop.f32.mrb[89].mxu0 }
 0x5e0   : > { %v2127_v3 = vpop.f32.mrb[90].mxu0 }
 0x5e1   : > { %2154 = vst [vmem:[%s3434_s24 + $0x40] sm:$0xff] %v2125_v29  ;;  %v2128_v34 = vadd.f32 %v2317_v61, %v2127_v3  ;;  %v2460_v57 = vpop.f32.mrb[91].mxu0 }
 0x5e3   : > { %2155 = vst [vmem:[%s3434_s24 + $0x48] sm:$0xff] %v2128_v34 }
 0x5e6   : > { %v2132_v14 = vpop.f32.mrb[92].mxu0 }
 0x5e7   : > { %v2133_v10 = vadd.f32 %v2317_v61, %v2132_v14  ;;  %v2463_v42 = vpop.f32.mrb[93].mxu0 }
 0x5e8   : > { %v2135_v5 = vpop.f32.mrb[94].mxu0 }
 0x5e9   : > { %2156 = vst [vmem:[%s3434_s24 + $0x50] sm:$0xff] %v2133_v10  ;;  %v2136_v27 = vadd.f32 %v2317_v61, %v2135_v5  ;;  %v2464_v33 = vpop.f32.mrb[95].mxu0 }
 0x5eb   : > { %2157 = vst [vmem:[%s3434_s24 + $0x58] sm:$0xff] %v2136_v27 }
 0x5ee   : > { %v2140_v11 = vpop.f32.mrb[96].mxu0 }
 0x5ef   : > { %v2141_v49 = vadd.f32 %v2317_v61, %v2140_v11  ;;  %v2467_v39 = vpop.f32.mrb[97].mxu0 }
 0x5f0   : > { %v2143_v9 = vpop.f32.mrb[98].mxu0 }
 0x5f1   : > { %2158 = vst [vmem:[%s3434_s24 + $0x60] sm:$0xff] %v2141_v49  ;;  %v2468_v18 = vpop.f32.mrb[99].mxu0 }
 0x5f2 PF: > { %s21_s17 = sadd.s32 1, %s2580_s17  }
 0x5f3   : > { %p18_p4 = scmp.ge.s32.totalorder %s21_s17, 5  }
 0x5f5   :  { %20 = sbr.rel (!%p18_p4) target bundleno = 1 (0x1), region = 94 }

</bundles_post_ra>
